<compile_context>
chip_gen: v7x
topology: tpu7x:2x2x1
jax: 0.10.0
libtpu: 0.0.40
codegen_flags: <defaults>
</compile_context>

<pallas_src>
import jax
import jax.numpy as jnp
from jax.experimental import pallas as pl
from jax.experimental.pallas import tpu as pltpu


CPAD = 128                      # lane-dense output-channel padding
BLOCK_CHANNELS = (16, 32, 64, 128)   # real out_filters per discriminator block
VMEM_LIMIT = 32 * 1024 * 1024


# ---------------------------------------------------------------------------
# Pallas kernels
# ---------------------------------------------------------------------------
def _conv_kernel(p_ref, w_ref, b_ref, o_ref):
    """Block 1 (bn=False): patches @ W (bf16 MXU, f32 acc) + bias + LeakyReLU."""
    y = jnp.dot(p_ref[...], w_ref[...], preferred_element_type=jnp.float32)
    y = y + b_ref[...]
    y = jnp.where(y > 0, y, 0.2 * y)          # LeakyReLU(0.2)
    # TODO(synk): Dropout2d(0.25) is identity (eval mode); training-mode
    # stochastic channel dropout is not implemented.
    o_ref[...] = y.astype(o_ref.dtype)


def _conv_bn_kernel(p_ref, w_ref, b_ref, scale_ref, shift_ref, o_ref):
    """Blocks 2-3: conv GEMM + bias + LeakyReLU + folded eval-mode BatchNorm."""
    y = jnp.dot(p_ref[...], w_ref[...], preferred_element_type=jnp.float32)
    y = y + b_ref[...]
    y = jnp.where(y > 0, y, 0.2 * y)
    y = y * scale_ref[...] + shift_ref[...]
    o_ref[...] = y.astype(o_ref.dtype)


def _conv_bn_head_kernel(p_ref, w_ref, b_ref, scale_ref, shift_ref,
                         wh_ref, sel_ref, bh_ref, o_ref):
    """Block 4 + fused Linear(->1) + Sigmoid head.

    The whole block-4 output (M = N*ho*wo rows, 128 channels) is one tile, so
    the head runs in the epilogue: VPU multiply by per-position head weights,
    batch-segment sum via a tiny (N,M)x(M,128) matmul, cross-lane sum, stable
    sigmoid.  Only the (N, 1) validity is written back.
    """
    y = jnp.dot(p_ref[...], w_ref[...], preferred_element_type=jnp.float32)
    y = y + b_ref[...]
    y = jnp.where(y > 0, y, 0.2 * y)
    y = y * scale_ref[...] + shift_ref[...]            # (M, 128) f32
    prod = y * wh_ref[...]                             # head weights, (M, 128)
    per_b = jnp.dot(sel_ref[...], prod,
                    preferred_element_type=jnp.float32)  # (N, 128)
    logit = jnp.sum(per_b, axis=-1, keepdims=True) + bh_ref[...]   # (N, 1)
    z = jnp.exp(-jnp.abs(logit))
    sig = jnp.where(logit >= 0, 1.0 / (1.0 + z), z / (1.0 + z))
    o_ref[...] = sig.astype(o_ref.dtype)


# ---------------------------------------------------------------------------
# Glue helpers
# ---------------------------------------------------------------------------
def _round_up(x, m):
    return (x + m - 1) // m * m


def _choose_tile_m(m, cap=512):
    """Largest sublane-aligned divisor of M, capped so that M >= 16 gives at
    least 2 grid steps (v7x two-TensorCore sharding + DMA/compute overlap)."""
    if m >= 16:
        cap = min(cap, m // 2)
    for t in (512, 256, 128, 64, 32, 16, 8):
        if t <= cap and m % t == 0:
            return t
    return m


def _im2col_nhwc(x):
    """NHWC im2col for kernel=3, stride=2, pad=1.
    Returns patches [N*Ho*Wo, 9*C] with columns ordered (kh, kw, c), c fastest."""
    n, h, w, c = x.shape
    ho = (h + 2 - 3) // 2 + 1
    wo = (w + 2 - 3) // 2 + 1
    xp = jnp.pad(x, ((0, 0), (1, 1), (1, 1), (0, 0)))
    cols = []
    for kh in range(3):
        for kw in range(3):
            cols.append(xp[:, kh:kh + 2 * ho:2, kw:kw + 2 * wo:2, :])  # [N,Ho,Wo,C]
    p = jnp.stack(cols, axis=3)                       # [N, Ho, Wo, 9, C]
    return p.reshape(n * ho * wo, 9 * c), ho, wo


def _prep_conv_params(w, b, scale, shift, cout_pad):
    """Fold layouts/padding once at init.

    w: [Cout, Cin, 3, 3] (PyTorch).  Uses the REAL Cin (no propagated channel
    padding), so Kp = round_up(9*Cin, 128).  Returns wm:[Kp, cout_pad] bf16
    with rows ordered (kh, kw, cin) to match the im2col column order, plus
    128-padded bias/scale/shift (padded channels: bias 0, scale 1, shift 0 ->
    they stay exact zeros and are never fed forward anyway).
    """
    cout, cin = w.shape[0], w.shape[1]
    wm = w.transpose(2, 3, 1, 0).reshape(9 * cin, cout)   # [9*Cin, Cout]
    k = 9 * cin
    kp = _round_up(k, 128)
    if kp > k:
        wm = jnp.pad(wm, ((0, kp - k), (0, 0)))
    if cout_pad > cout:
        wm = jnp.pad(wm, ((0, 0), (0, cout_pad - cout)))
        b = jnp.pad(b, (0, cout_pad - cout))
        if scale is not None:
            scale = jnp.pad(scale, (0, cout_pad - cout), constant_values=1.0)
            shift = jnp.pad(shift, (0, cout_pad - cout))
    return wm.astype(jnp.bfloat16), b, scale, shift


def _make_patches(x, kp):
    """im2col + K-pad + bf16 cast.  Returns (patches [M, Kp] bf16, ho, wo)."""
    p, ho, wo = _im2col_nhwc(x)
    m, k = p.shape
    if kp > k:
        p = jnp.pad(p, ((0, 0), (0, kp - k)))
    return p.astype(jnp.bfloat16), ho, wo


# ---------------------------------------------------------------------------
# Pallas wrappers
# ---------------------------------------------------------------------------
def conv_block_nhwc(x, blk):
    """One discriminator block (1-3) on NHWC input -> NHWC (M, 128-padded)."""
    n = x.shape[0]
    wm = blk["wm"]
    kp, cp = wm.shape

    p, ho, wo = _make_patches(x, kp)
    m = p.shape[0]
    tile_m = _choose_tile_m(m)
    grid = (m // tile_m,)

    has_bn = blk["scale"] is not None
    kernel = _conv_bn_kernel if has_bn else _conv_kernel
    operands = [p, wm, blk["b"].reshape(1, cp)]
    in_specs = [
        pl.BlockSpec((tile_m, kp), lambda i: (i, 0)),   # streamed patch tiles
        pl.BlockSpec((kp, cp), lambda i: (0, 0)),       # resident weights
        pl.BlockSpec((1, cp), lambda i: (0, 0)),        # bias
    ]
    if has_bn:
        operands += [blk["scale"].reshape(1, cp), blk["shift"].reshape(1, cp)]
        in_specs += [pl.BlockSpec((1, cp), lambda i: (0, 0)),
                     pl.BlockSpec((1, cp), lambda i: (0, 0))]

    out = pl.pallas_call(
        kernel,
        out_shape=jax.ShapeDtypeStruct((m, cp), jnp.bfloat16),
        grid=grid,
        in_specs=in_specs,
        out_specs=pl.BlockSpec((tile_m, cp), lambda i: (i, 0)),
        compiler_params=pltpu.CompilerParams(
            dimension_semantics=("parallel",),
            vmem_limit_bytes=VMEM_LIMIT),
    )(*operands)

    return out.reshape(n, ho, wo, cp)                  # stay NHWC


def conv_block_head(x, blk, adv_w_pos, adv_b):
    """Last block (bn=True) with the Linear+Sigmoid head fused in-kernel."""
    n = x.shape[0]
    wm = blk["wm"]
    kp, cp = wm.shape

    p, ho, wo = _make_patches(x, kp)
    m = p.shape[0]
    hw = ho * wo

    wh = jnp.tile(adv_w_pos, (n, 1)).astype(jnp.float32)            # (M, 128)
    sel = jnp.repeat(jnp.eye(n, dtype=jnp.float32), hw, axis=1)     # (N, M)

    return pl.pallas_call(
        _conv_bn_head_kernel,
        out_shape=jax.ShapeDtypeStruct((n, 1), jnp.float32),
        grid=(1,),
        in_specs=[
            pl.BlockSpec((m, kp), lambda i: (0, 0)),
            pl.BlockSpec((kp, cp), lambda i: (0, 0)),
            pl.BlockSpec((1, cp), lambda i: (0, 0)),
            pl.BlockSpec((1, cp), lambda i: (0, 0)),
            pl.BlockSpec((1, cp), lambda i: (0, 0)),
            pl.BlockSpec((m, cp), lambda i: (0, 0)),
            pl.BlockSpec((n, m), lambda i: (0, 0)),
            pl.BlockSpec((1, 1), lambda i: (0, 0)),
        ],
        out_specs=pl.BlockSpec((n, 1), lambda i: (0, 0)),
        compiler_params=pltpu.CompilerParams(
            dimension_semantics=("arbitrary",),
            vmem_limit_bytes=VMEM_LIMIT),
    )(p, wm, blk["b"].reshape(1, cp), blk["scale"].reshape(1, cp),
      blk["shift"].reshape(1, cp), wh, sel, adv_b.reshape(1, 1))


def discriminator_forward(img, params):
    # NCHW (public interface) -> NHWC, bf16 activations between blocks.
    x = img.transpose(0, 2, 3, 1).astype(jnp.bfloat16)
    blocks = params["blocks"]
    for blk, cout in zip(blocks[:-1], BLOCK_CHANNELS[:-1]):
        x = conv_block_nhwc(x, blk)
        x = x[..., :cout]     # drop padded lanes so K doesn't inflate next layer
    return conv_block_head(x, blocks[-1], params["adv_w_pos"], params["adv_b"])


# ---------------------------------------------------------------------------
# Deterministic parameter init (shapes per Discriminator.__init__)
# ---------------------------------------------------------------------------
def init_params(key, channels, img_size):
    specs = [(channels, BLOCK_CHANNELS[0], False),
             (BLOCK_CHANNELS[0], BLOCK_CHANNELS[1], True),
             (BLOCK_CHANNELS[1], BLOCK_CHANNELS[2], True),
             (BLOCK_CHANNELS[2], BLOCK_CHANNELS[3], True)]
    blocks = []
    for cin, cout, bn in specs:
        key, k1, k2, k3, k4 = jax.random.split(key, 5)
        w = jax.random.normal(k1, (cout, cin, 3, 3), jnp.float32) * 0.05
        b = jax.random.normal(k2, (cout,), jnp.float32) * 0.05
        if bn:
            # BatchNorm2d(out_filters, 0.8): eps = 0.8 (positional-arg quirk);
            # eval mode uses running stats (mean=0, var=1 at init), folded.
            eps = 0.8
            gamma = 1.0 + 0.1 * jax.random.normal(k3, (cout,), jnp.float32)
            beta = 0.1 * jax.random.normal(k4, (cout,), jnp.float32)
            rmean = jnp.zeros((cout,), jnp.float32)
            rvar = jnp.ones((cout,), jnp.float32)
            scale = gamma / jnp.sqrt(rvar + eps)
            shift = beta - rmean * scale
        else:
            scale = None
            shift = None
        wm, bp, sp, shp = _prep_conv_params(w, b, scale, shift, CPAD)
        blocks.append(dict(wm=wm, b=bp, scale=sp, shift=shp))

    ds = img_size // (2 ** 4)
    feat = BLOCK_CHANNELS[-1] * ds * ds
    key, k1, k2 = jax.random.split(key, 3)
    adv_w = jax.random.normal(k1, (1, feat), jnp.float32) * 0.05
    adv_b = jax.random.normal(k2, (1,), jnp.float32) * 0.05
    # Permute Linear columns from PyTorch NCHW-flatten order (c,h,w) to our
    # NHWC row order: per-position weight rows ordered (h,w) with c on lanes.
    adv_w_pos = adv_w.reshape(BLOCK_CHANNELS[-1], ds, ds) \
                     .transpose(1, 2, 0).reshape(ds * ds, BLOCK_CHANNELS[-1])
    return dict(blocks=blocks, adv_w_pos=adv_w_pos, adv_b=adv_b)


if __name__ == "__main__":
    batch, channels, img_size = 2, 3, 32
    key = jax.random.PRNGKey(0)
    key, kimg, kparam = jax.random.split(key, 3)

    img = jax.random.normal(kimg, (batch, channels, img_size, img_size), jnp.float32)
    params = init_params(kparam, channels, img_size)

    fwd = jax.jit(discriminator_forward)
    validity = fwd(img, params)
    validity = jax.block_until_ready(validity)

    assert validity.shape == (batch, 1)
    assert bool(jnp.all((validity >= 0.0) & (validity <= 1.0)))
    assert bool(jnp.all(jnp.isfinite(validity)))
    print("KERNEL_OK")
</pallas_src>

<mosaic_0001>
module attributes {stable_mosaic.version = 11 : i64} {
  func.func @_conv_kernel(%arg0: i32, %arg1: memref<256x128xbf16, #tpu.memory_space<vmem>>, %arg2: memref<128x128xbf16, #tpu.memory_space<vmem>>, %arg3: memref<1x128xf32, #tpu.memory_space<vmem>>, %arg4: memref<256x128xbf16, #tpu.memory_space<vmem>>) attributes {dimension_semantics = [#tpu.dimension_semantics<parallel>], iteration_bounds = array<i64: 2>, scalar_prefetch = 0 : i64, scratch_operands = 0 : i64, tpu.core_type = #tpu.core_type<tc>, window_params = [{transform_indices = @transform_0, window_bounds = array<i64: 256, 128>}, {pipeline_mode = #tpu.pipeline_mode<synchronous>, transform_indices = @transform_1, window_bounds = array<i64: 128, 128>}, {pipeline_mode = #tpu.pipeline_mode<synchronous>, transform_indices = @transform_2, window_bounds = array<i64: 1, 128>}, {transform_indices = @transform_3, window_bounds = array<i64: 256, 128>}]} {
    %c0 = arith.constant 0 : index
    %c0_0 = arith.constant 0 : index
    %0 = vector.load %arg1[%c0, %c0_0] : memref<256x128xbf16, #tpu.memory_space<vmem>>, vector<256x128xbf16>
    %c0_1 = arith.constant 0 : index
    %c0_2 = arith.constant 0 : index
    %1 = vector.load %arg2[%c0_1, %c0_2] : memref<128x128xbf16, #tpu.memory_space<vmem>>, vector<128x128xbf16>
    %cst = arith.constant dense<0.000000e+00> : vector<256x128xf32>
    %2 = tpu.matmul %0, %1, %cst {dimension_numbers = #tpu.dot_dimension_numbers<[1], [0], [0], [1], [0, 0, 1, 1], [], []>} : vector<256x128xbf16>, vector<128x128xbf16>, vector<256x128xf32> -> vector<256x128xf32>
    %c0_3 = arith.constant 0 : index
    %c0_4 = arith.constant 0 : index
    %3 = vector.load %arg3[%c0_3, %c0_4] : memref<1x128xf32, #tpu.memory_space<vmem>>, vector<1x128xf32>
    %4 = vector.broadcast %3 : vector<1x128xf32> to vector<256x128xf32>
    %5 = arith.addf %2, %4 : vector<256x128xf32>
    %cst_5 = arith.constant 0.000000e+00 : f32
    %6 = vector.broadcast %cst_5 : f32 to vector<256x128xf32>
    %7 = arith.cmpf ogt, %5, %6 : vector<256x128xf32>
    %cst_6 = arith.constant 2.000000e-01 : f32
    %8 = vector.broadcast %cst_6 : f32 to vector<256x128xf32>
    %9 = arith.mulf %8, %5 : vector<256x128xf32>
    %10 = arith.select %7, %5, %9 : vector<256x128xi1>, vector<256x128xf32>
    %11 = arith.truncf %10 : vector<256x128xf32> to vector<256x128xbf16>
    %c0_7 = arith.constant 0 : index
    %c0_8 = arith.constant 0 : index
    %12 = vector.load %arg4[%c0_7, %c0_8] : memref<256x128xbf16, #tpu.memory_space<vmem>>, vector<256x128xbf16>
    tpu.vector_store %arg4[%c0_7, %c0_8], %11 {strides = array<i32>} : memref<256x128xbf16, #tpu.memory_space<vmem>>, vector<256x128xbf16>,
    return
  }
  func.func @transform_0(%arg0: i32) -> (i32, i32) {
    %c0_i32 = arith.constant 0 : i32
    %c0_i32_0 = arith.constant 0 : i32
    return %arg0, %c0_i32 : i32, i32
  }
  func.func @transform_1(%arg0: i32) -> (i32, i32) {
    %c0_i32 = arith.constant 0 : i32
    %c0_i32_0 = arith.constant 0 : i32
    %c0_i32_1 = arith.constant 0 : i32
    return %c0_i32, %c0_i32_0 : i32, i32
  }
  func.func @transform_2(%arg0: i32) -> (i32, i32) {
    %c0_i32 = arith.constant 0 : i32
    %c0_i32_0 = arith.constant 0 : i32
    %c0_i32_1 = arith.constant 0 : i32
    return %c0_i32, %c0_i32_0 : i32, i32
  }
  func.func @transform_3(%arg0: i32) -> (i32, i32) {
    %c0_i32 = arith.constant 0 : i32
    %c0_i32_0 = arith.constant 0 : i32
    return %arg0, %c0_i32 : i32, i32
  }
}

module attributes {stable_mosaic.version = 11 : i64} {
  func.func @_conv_bn_kernel(%arg0: i32, %arg1: memref<64x256xbf16, #tpu.memory_space<vmem>>, %arg2: memref<256x128xbf16, #tpu.memory_space<vmem>>, %arg3: memref<1x128xf32, #tpu.memory_space<vmem>>, %arg4: memref<1x128xf32, #tpu.memory_space<vmem>>, %arg5: memref<1x128xf32, #tpu.memory_space<vmem>>, %arg6: memref<64x128xbf16, #tpu.memory_space<vmem>>) attributes {dimension_semantics = [#tpu.dimension_semantics<parallel>], iteration_bounds = array<i64: 2>, scalar_prefetch = 0 : i64, scratch_operands = 0 : i64, tpu.core_type = #tpu.core_type<tc>, window_params = [{transform_indices = @transform_0, window_bounds = array<i64: 64, 256>}, {pipeline_mode = #tpu.pipeline_mode<synchronous>, transform_indices = @transform_1, window_bounds = array<i64: 256, 128>}, {pipeline_mode = #tpu.pipeline_mode<synchronous>, transform_indices = @transform_2, window_bounds = array<i64: 1, 128>}, {pipeline_mode = #tpu.pipeline_mode<synchronous>, transform_indices = @transform_3, window_bounds = array<i64: 1, 128>}, {pipeline_mode = #tpu.pipeline_mode<synchronous>, transform_indices = @transform_4, window_bounds = array<i64: 1, 128>}, {transform_indices = @transform_5, window_bounds = array<i64: 64, 128>}]} {
    %c0 = arith.constant 0 : index
    %c0_0 = arith.constant 0 : index
    %0 = vector.load %arg1[%c0, %c0_0] : memref<64x256xbf16, #tpu.memory_space<vmem>>, vector<64x256xbf16>
    %c0_1 = arith.constant 0 : index
    %c0_2 = arith.constant 0 : index
    %1 = vector.load %arg2[%c0_1, %c0_2] : memref<256x128xbf16, #tpu.memory_space<vmem>>, vector<256x128xbf16>
    %cst = arith.constant dense<0.000000e+00> : vector<64x128xf32>
    %2 = tpu.matmul %0, %1, %cst {dimension_numbers = #tpu.dot_dimension_numbers<[1], [0], [0], [1], [0, 0, 1, 1], [], []>} : vector<64x256xbf16>, vector<256x128xbf16>, vector<64x128xf32> -> vector<64x128xf32>
    %c0_3 = arith.constant 0 : index
    %c0_4 = arith.constant 0 : index
    %3 = vector.load %arg3[%c0_3, %c0_4] : memref<1x128xf32, #tpu.memory_space<vmem>>, vector<1x128xf32>
    %4 = vector.broadcast %3 : vector<1x128xf32> to vector<64x128xf32>
    %5 = arith.addf %2, %4 : vector<64x128xf32>
    %cst_5 = arith.constant 0.000000e+00 : f32
    %6 = vector.broadcast %cst_5 : f32 to vector<64x128xf32>
    %7 = arith.cmpf ogt, %5, %6 : vector<64x128xf32>
    %cst_6 = arith.constant 2.000000e-01 : f32
    %8 = vector.broadcast %cst_6 : f32 to vector<64x128xf32>
    %9 = arith.mulf %8, %5 : vector<64x128xf32>
    %10 = arith.select %7, %5, %9 : vector<64x128xi1>, vector<64x128xf32>
    %c0_7 = arith.constant 0 : index
    %c0_8 = arith.constant 0 : index
    %11 = vector.load %arg4[%c0_7, %c0_8] : memref<1x128xf32, #tpu.memory_space<vmem>>, vector<1x128xf32>
    %12 = vector.broadcast %11 : vector<1x128xf32> to vector<64x128xf32>
    %13 = arith.mulf %10, %12 : vector<64x128xf32>
    %c0_9 = arith.constant 0 : index
    %c0_10 = arith.constant 0 : index
    %14 = vector.load %arg5[%c0_9, %c0_10] : memref<1x128xf32, #tpu.memory_space<vmem>>, vector<1x128xf32>
    %15 = vector.broadcast %14 : vector<1x128xf32> to vector<64x128xf32>
    %16 = arith.addf %13, %15 : vector<64x128xf32>
    %17 = arith.truncf %16 : vector<64x128xf32> to vector<64x128xbf16>
    %c0_11 = arith.constant 0 : index
    %c0_12 = arith.constant 0 : index
    %18 = vector.load %arg6[%c0_11, %c0_12] : memref<64x128xbf16, #tpu.memory_space<vmem>>, vector<64x128xbf16>
    tpu.vector_store %arg6[%c0_11, %c0_12], %17 {strides = array<i32>} : memref<64x128xbf16, #tpu.memory_space<vmem>>, vector<64x128xbf16>,
    return
  }
  func.func @transform_0(%arg0: i32) -> (i32, i32) {
    %c0_i32 = arith.constant 0 : i32
    %c0_i32_0 = arith.constant 0 : i32
    return %arg0, %c0_i32 : i32, i32
  }
  func.func @transform_1(%arg0: i32) -> (i32, i32) {
    %c0_i32 = arith.constant 0 : i32
    %c0_i32_0 = arith.constant 0 : i32
    %c0_i32_1 = arith.constant 0 : i32
    return %c0_i32, %c0_i32_0 : i32, i32
  }
  func.func @transform_2(%arg0: i32) -> (i32, i32) {
    %c0_i32 = arith.constant 0 : i32
    %c0_i32_0 = arith.constant 0 : i32
    %c0_i32_1 = arith.constant 0 : i32
    return %c0_i32, %c0_i32_0 : i32, i32
  }
  func.func @transform_3(%arg0: i32) -> (i32, i32) {
    %c0_i32 = arith.constant 0 : i32
    %c0_i32_0 = arith.constant 0 : i32
    %c0_i32_1 = arith.constant 0 : i32
    return %c0_i32, %c0_i32_0 : i32, i32
  }
  func.func @transform_4(%arg0: i32) -> (i32, i32) {
    %c0_i32 = arith.constant 0 : i32
    %c0_i32_0 = arith.constant 0 : i32
    %c0_i32_1 = arith.constant 0 : i32
    return %c0_i32, %c0_i32_0 : i32, i32
  }
  func.func @transform_5(%arg0: i32) -> (i32, i32) {
    %c0_i32 = arith.constant 0 : i32
    %c0_i32_0 = arith.constant 0 : i32
    return %arg0, %c0_i32 : i32, i32
  }
}

module attributes {stable_mosaic.version = 11 : i64} {
  func.func @_conv_bn_kernel(%arg0: i32, %arg1: memref<16x384xbf16, #tpu.memory_space<vmem>>, %arg2: memref<384x128xbf16, #tpu.memory_space<vmem>>, %arg3: memref<1x128xf32, #tpu.memory_space<vmem>>, %arg4: memref<1x128xf32, #tpu.memory_space<vmem>>, %arg5: memref<1x128xf32, #tpu.memory_space<vmem>>, %arg6: memref<16x128xbf16, #tpu.memory_space<vmem>>) attributes {dimension_semantics = [#tpu.dimension_semantics<parallel>], iteration_bounds = array<i64: 2>, scalar_prefetch = 0 : i64, scratch_operands = 0 : i64, tpu.core_type = #tpu.core_type<tc>, window_params = [{transform_indices = @transform_0, window_bounds = array<i64: 16, 384>}, {pipeline_mode = #tpu.pipeline_mode<synchronous>, transform_indices = @transform_1, window_bounds = array<i64: 384, 128>}, {pipeline_mode = #tpu.pipeline_mode<synchronous>, transform_indices = @transform_2, window_bounds = array<i64: 1, 128>}, {pipeline_mode = #tpu.pipeline_mode<synchronous>, transform_indices = @transform_3, window_bounds = array<i64: 1, 128>}, {pipeline_mode = #tpu.pipeline_mode<synchronous>, transform_indices = @transform_4, window_bounds = array<i64: 1, 128>}, {transform_indices = @transform_5, window_bounds = array<i64: 16, 128>}]} {
    %c0 = arith.constant 0 : index
    %c0_0 = arith.constant 0 : index
    %0 = vector.load %arg1[%c0, %c0_0] : memref<16x384xbf16, #tpu.memory_space<vmem>>, vector<16x384xbf16>
    %c0_1 = arith.constant 0 : index
    %c0_2 = arith.constant 0 : index
    %1 = vector.load %arg2[%c0_1, %c0_2] : memref<384x128xbf16, #tpu.memory_space<vmem>>, vector<384x128xbf16>
    %cst = arith.constant dense<0.000000e+00> : vector<16x128xf32>
    %2 = tpu.matmul %0, %1, %cst {dimension_numbers = #tpu.dot_dimension_numbers<[1], [0], [0], [1], [0, 0, 1, 1], [], []>} : vector<16x384xbf16>, vector<384x128xbf16>, vector<16x128xf32> -> vector<16x128xf32>
    %c0_3 = arith.constant 0 : index
    %c0_4 = arith.constant 0 : index
    %3 = vector.load %arg3[%c0_3, %c0_4] : memref<1x128xf32, #tpu.memory_space<vmem>>, vector<1x128xf32>
    %4 = vector.broadcast %3 : vector<1x128xf32> to vector<16x128xf32>
    %5 = arith.addf %2, %4 : vector<16x128xf32>
    %cst_5 = arith.constant 0.000000e+00 : f32
    %6 = vector.broadcast %cst_5 : f32 to vector<16x128xf32>
    %7 = arith.cmpf ogt, %5, %6 : vector<16x128xf32>
    %cst_6 = arith.constant 2.000000e-01 : f32
    %8 = vector.broadcast %cst_6 : f32 to vector<16x128xf32>
    %9 = arith.mulf %8, %5 : vector<16x128xf32>
    %10 = arith.select %7, %5, %9 : vector<16x128xi1>, vector<16x128xf32>
    %c0_7 = arith.constant 0 : index
    %c0_8 = arith.constant 0 : index
    %11 = vector.load %arg4[%c0_7, %c0_8] : memref<1x128xf32, #tpu.memory_space<vmem>>, vector<1x128xf32>
    %12 = vector.broadcast %11 : vector<1x128xf32> to vector<16x128xf32>
    %13 = arith.mulf %10, %12 : vector<16x128xf32>
    %c0_9 = arith.constant 0 : index
    %c0_10 = arith.constant 0 : index
    %14 = vector.load %arg5[%c0_9, %c0_10] : memref<1x128xf32, #tpu.memory_space<vmem>>, vector<1x128xf32>
    %15 = vector.broadcast %14 : vector<1x128xf32> to vector<16x128xf32>
    %16 = arith.addf %13, %15 : vector<16x128xf32>
    %17 = arith.truncf %16 : vector<16x128xf32> to vector<16x128xbf16>
    %c0_11 = arith.constant 0 : index
    %c0_12 = arith.constant 0 : index
    %18 = vector.load %arg6[%c0_11, %c0_12] : memref<16x128xbf16, #tpu.memory_space<vmem>>, vector<16x128xbf16>
    tpu.vector_store %arg6[%c0_11, %c0_12], %17 {strides = array<i32>} : memref<16x128xbf16, #tpu.memory_space<vmem>>, vector<16x128xbf16>,
    return
  }
  func.func @transform_0(%arg0: i32) -> (i32, i32) {
    %c0_i32 = arith.constant 0 : i32
    %c0_i32_0 = arith.constant 0 : i32
    return %arg0, %c0_i32 : i32, i32
  }
  func.func @transform_1(%arg0: i32) -> (i32, i32) {
    %c0_i32 = arith.constant 0 : i32
    %c0_i32_0 = arith.constant 0 : i32
    %c0_i32_1 = arith.constant 0 : i32
    return %c0_i32, %c0_i32_0 : i32, i32
  }
  func.func @transform_2(%arg0: i32) -> (i32, i32) {
    %c0_i32 = arith.constant 0 : i32
    %c0_i32_0 = arith.constant 0 : i32
    %c0_i32_1 = arith.constant 0 : i32
    return %c0_i32, %c0_i32_0 : i32, i32
  }
  func.func @transform_3(%arg0: i32) -> (i32, i32) {
    %c0_i32 = arith.constant 0 : i32
    %c0_i32_0 = arith.constant 0 : i32
    %c0_i32_1 = arith.constant 0 : i32
    return %c0_i32, %c0_i32_0 : i32, i32
  }
  func.func @transform_4(%arg0: i32) -> (i32, i32) {
    %c0_i32 = arith.constant 0 : i32
    %c0_i32_0 = arith.constant 0 : i32
    %c0_i32_1 = arith.constant 0 : i32
    return %c0_i32, %c0_i32_0 : i32, i32
  }
  func.func @transform_5(%arg0: i32) -> (i32, i32) {
    %c0_i32 = arith.constant 0 : i32
    %c0_i32_0 = arith.constant 0 : i32
    return %arg0, %c0_i32 : i32, i32
  }
}

module attributes {stable_mosaic.version = 11 : i64} {
  func.func @_conv_bn_head_kernel(%arg0: i32, %arg1: memref<8x640xbf16, #tpu.memory_space<vmem>>, %arg2: memref<640x128xbf16, #tpu.memory_space<vmem>>, %arg3: memref<1x128xf32, #tpu.memory_space<vmem>>, %arg4: memref<1x128xf32, #tpu.memory_space<vmem>>, %arg5: memref<1x128xf32, #tpu.memory_space<vmem>>, %arg6: memref<8x128xf32, #tpu.memory_space<vmem>>, %arg7: memref<2x8xf32, #tpu.memory_space<vmem>>, %arg8: memref<1x1xf32, #tpu.memory_space<vmem>>, %arg9: memref<2x1xf32, #tpu.memory_space<vmem>>) attributes {dimension_semantics = [#tpu.dimension_semantics<arbitrary>], iteration_bounds = array<i64: 1>, scalar_prefetch = 0 : i64, scratch_operands = 0 : i64, tpu.core_type = #tpu.core_type<tc>, window_params = [{pipeline_mode = #tpu.pipeline_mode<synchronous>, transform_indices = @transform_0, window_bounds = array<i64: 8, 640>}, {pipeline_mode = #tpu.pipeline_mode<synchronous>, transform_indices = @transform_1, window_bounds = array<i64: 640, 128>}, {pipeline_mode = #tpu.pipeline_mode<synchronous>, transform_indices = @transform_2, window_bounds = array<i64: 1, 128>}, {pipeline_mode = #tpu.pipeline_mode<synchronous>, transform_indices = @transform_3, window_bounds = array<i64: 1, 128>}, {pipeline_mode = #tpu.pipeline_mode<synchronous>, transform_indices = @transform_4, window_bounds = array<i64: 1, 128>}, {pipeline_mode = #tpu.pipeline_mode<synchronous>, transform_indices = @transform_5, window_bounds = array<i64: 8, 128>}, {pipeline_mode = #tpu.pipeline_mode<synchronous>, transform_indices = @transform_6, window_bounds = array<i64: 2, 8>}, {pipeline_mode = #tpu.pipeline_mode<synchronous>, transform_indices = @transform_7, window_bounds = array<i64: 1, 1>}, {pipeline_mode = #tpu.pipeline_mode<synchronous>, transform_indices = @transform_8, window_bounds = array<i64: 2, 1>}]} {
    %c0 = arith.constant 0 : index
    %c0_0 = arith.constant 0 : index
    %0 = vector.load %arg1[%c0, %c0_0] : memref<8x640xbf16, #tpu.memory_space<vmem>>, vector<8x640xbf16>
    %c0_1 = arith.constant 0 : index
    %c0_2 = arith.constant 0 : index
    %1 = vector.load %arg2[%c0_1, %c0_2] : memref<640x128xbf16, #tpu.memory_space<vmem>>, vector<640x128xbf16>
    %cst = arith.constant dense<0.000000e+00> : vector<8x128xf32>
    %2 = tpu.matmul %0, %1, %cst {dimension_numbers = #tpu.dot_dimension_numbers<[1], [0], [0], [1], [0, 0, 1, 1], [], []>} : vector<8x640xbf16>, vector<640x128xbf16>, vector<8x128xf32> -> vector<8x128xf32>
    %c0_3 = arith.constant 0 : index
    %c0_4 = arith.constant 0 : index
    %3 = vector.load %arg3[%c0_3, %c0_4] : memref<1x128xf32, #tpu.memory_space<vmem>>, vector<1x128xf32>
    %4 = vector.broadcast %3 : vector<1x128xf32> to vector<8x128xf32>
    %5 = arith.addf %2, %4 : vector<8x128xf32>
    %cst_5 = arith.constant 0.000000e+00 : f32
    %6 = vector.broadcast %cst_5 : f32 to vector<8x128xf32>
    %7 = arith.cmpf ogt, %5, %6 : vector<8x128xf32>
    %cst_6 = arith.constant 2.000000e-01 : f32
    %8 = vector.broadcast %cst_6 : f32 to vector<8x128xf32>
    %9 = arith.mulf %8, %5 : vector<8x128xf32>
    %10 = arith.select %7, %5, %9 : vector<8x128xi1>, vector<8x128xf32>
    %c0_7 = arith.constant 0 : index
    %c0_8 = arith.constant 0 : index
    %11 = vector.load %arg4[%c0_7, %c0_8] : memref<1x128xf32, #tpu.memory_space<vmem>>, vector<1x128xf32>
    %12 = vector.broadcast %11 : vector<1x128xf32> to vector<8x128xf32>
    %13 = arith.mulf %10, %12 : vector<8x128xf32>
    %c0_9 = arith.constant 0 : index
    %c0_10 = arith.constant 0 : index
    %14 = vector.load %arg5[%c0_9, %c0_10] : memref<1x128xf32, #tpu.memory_space<vmem>>, vector<1x128xf32>
    %15 = vector.broadcast %14 : vector<1x128xf32> to vector<8x128xf32>
    %16 = arith.addf %13, %15 : vector<8x128xf32>
    %c0_11 = arith.constant 0 : index
    %c0_12 = arith.constant 0 : index
    %17 = vector.load %arg6[%c0_11, %c0_12] : memref<8x128xf32, #tpu.memory_space<vmem>>, vector<8x128xf32>
    %18 = arith.mulf %16, %17 : vector<8x128xf32>
    %c0_13 = arith.constant 0 : index
    %c0_14 = arith.constant 0 : index
    %19 = vector.load %arg7[%c0_13, %c0_14] : memref<2x8xf32, #tpu.memory_space<vmem>>, vector<2x8xf32>
    %cst_15 = arith.constant dense<0.000000e+00> : vector<2x128xf32>
    %20 = tpu.matmul %19, %18, %cst_15 {dimension_numbers = #tpu.dot_dimension_numbers<[1], [0], [0], [1], [0, 0, 1, 1], [], []>} : vector<2x8xf32>, vector<8x128xf32>, vector<2x128xf32> -> vector<2x128xf32>
    %cst_16 = arith.constant dense<0.000000e+00> : vector<2xf32>
    %21 = vector.multi_reduction <add>, %20, %cst_16 [1] : vector<2x128xf32> to vector<2xf32>
    %22 = vector.shape_cast %21 : vector<2xf32> to vector<2x1xf32>
    %c0_17 = arith.constant 0 : index
    %c0_18 = arith.constant 0 : index
    %23 = vector.load %arg8[%c0_17, %c0_18] : memref<1x1xf32, #tpu.memory_space<vmem>>, vector<1x1xf32>
    %24 = vector.broadcast %23 : vector<1x1xf32> to vector<2x1xf32>
    %25 = arith.addf %22, %24 : vector<2x1xf32>
    %26 = math.absf %25 : vector<2x1xf32>
    %cst_19 = arith.constant 0.000000e+00 : f32
    %27 = vector.broadcast %cst_19 : f32 to vector<2x1xf32>
    %28 = arith.subf %27, %26 : vector<2x1xf32>
    %29 = math.exp %28 : vector<2x1xf32>
    %cst_20 = arith.constant 0.000000e+00 : f32
    %30 = vector.broadcast %cst_20 : f32 to vector<2x1xf32>
    %31 = arith.cmpf oge, %25, %30 : vector<2x1xf32>
    %cst_21 = arith.constant 1.000000e+00 : f32
    %32 = vector.broadcast %cst_21 : f32 to vector<2x1xf32>
    %33 = arith.addf %32, %29 : vector<2x1xf32>
    %cst_22 = arith.constant 1.000000e+00 : f32
    %34 = vector.broadcast %cst_22 : f32 to vector<2x1xf32>
    %35 = arith.divf %34, %33 : vector<2x1xf32>
    %cst_23 = arith.constant 1.000000e+00 : f32
    %36 = vector.broadcast %cst_23 : f32 to vector<2x1xf32>
    %37 = arith.addf %36, %29 : vector<2x1xf32>
    %38 = arith.divf %29, %37 : vector<2x1xf32>
    %39 = arith.select %31, %35, %38 : vector<2x1xi1>, vector<2x1xf32>
    %c0_24 = arith.constant 0 : index
    %c0_25 = arith.constant 0 : index
    %40 = vector.load %arg9[%c0_24, %c0_25] : memref<2x1xf32, #tpu.memory_space<vmem>>, vector<2x1xf32>
    tpu.vector_store %arg9[%c0_24, %c0_25], %39 {strides = array<i32>} : memref<2x1xf32, #tpu.memory_space<vmem>>, vector<2x1xf32>,
    return
  }
  func.func @transform_0(%arg0: i32) -> (i32, i32) {
    %c0_i32 = arith.constant 0 : i32
    %c0_i32_0 = arith.constant 0 : i32
    %c0_i32_1 = arith.constant 0 : i32
    return %c0_i32, %c0_i32_0 : i32, i32
  }
  func.func @transform_1(%arg0: i32) -> (i32, i32) {
    %c0_i32 = arith.constant 0 : i32
    %c0_i32_0 = arith.constant 0 : i32
    %c0_i32_1 = arith.constant 0 : i32
    return %c0_i32, %c0_i32_0 : i32, i32
  }
  func.func @transform_2(%arg0: i32) -> (i32, i32) {
    %c0_i32 = arith.constant 0 : i32
    %c0_i32_0 = arith.constant 0 : i32
    %c0_i32_1 = arith.constant 0 : i32
    return %c0_i32, %c0_i32_0 : i32, i32
  }
  func.func @transform_3(%arg0: i32) -> (i32, i32) {
    %c0_i32 = arith.constant 0 : i32
    %c0_i32_0 = arith.constant 0 : i32
    %c0_i32_1 = arith.constant 0 : i32
    return %c0_i32, %c0_i32_0 : i32, i32
  }
  func.func @transform_4(%arg0: i32) -> (i32, i32) {
    %c0_i32 = arith.constant 0 : i32
    %c0_i32_0 = arith.constant 0 : i32
    %c0_i32_1 = arith.constant 0 : i32
    return %c0_i32, %c0_i32_0 : i32, i32
  }
  func.func @transform_5(%arg0: i32) -> (i32, i32) {
    %c0_i32 = arith.constant 0 : i32
    %c0_i32_0 = arith.constant 0 : i32
    %c0_i32_1 = arith.constant 0 : i32
    return %c0_i32, %c0_i32_0 : i32, i32
  }
  func.func @transform_6(%arg0: i32) -> (i32, i32) {
    %c0_i32 = arith.constant 0 : i32
    %c0_i32_0 = arith.constant 0 : i32
    %c0_i32_1 = arith.constant 0 : i32
    return %c0_i32, %c0_i32_0 : i32, i32
  }
  func.func @transform_7(%arg0: i32) -> (i32, i32) {
    %c0_i32 = arith.constant 0 : i32
    %c0_i32_0 = arith.constant 0 : i32
    %c0_i32_1 = arith.constant 0 : i32
    return %c0_i32, %c0_i32_0 : i32, i32
  }
  func.func @transform_8(%arg0: i32) -> (i32, i32) {
    %c0_i32 = arith.constant 0 : i32
    %c0_i32_0 = arith.constant 0 : i32
    %c0_i32_1 = arith.constant 0 : i32
    return %c0_i32, %c0_i32_0 : i32, i32
  }
}

</mosaic_0001>

<bundles_post_ra>
// kernel: discriminator_forward.4
= control target key start
LH: loop header
LB: loop body
LE: loop exit
PB: predicated region body
PF: predicated region fallthrough
CT: control target
= control target key end

     0   :  { %s1190_s12 = smov 0   ;;  %s1317_s0 = inlined_call_operand.vmem [shape: bf16[512,128], index: 0, kind: input, shape index: {}]   ;;  %s1318_s1 = inlined_call_operand.vmem [shape: bf16[128,128], index: 1, kind: input, shape index: {}]   ;;  %s1319_s2 = inlined_call_operand.vmem [shape: f32[1,128], index: 2, kind: input, shape index: {}]   ;;  %s1320_s3 = inlined_call_operand.vmem [shape: bf16[512,128], index: 3, kind: output, shape index: {}]  }
   0x1 LB: > { %s847_s13 = sadd.s32 4294967295, %s1168_s12   ;;  %p851_p0 = scmp.ge.s32.totalorder %s1168_s12, 1  ;;  %s1168_s12 = sphi %s1190_s12, %s13_s12  }
   0x2   : > { %p138_p1 = scmp.lt.s32.totalorder %s1168_s12, 3 }
   0x4   : > { %p139_p2 = pnand %p851_p0, %p138_p1 }
   0x5   : > { %v1138_v0 = vld [vmem:[%s1318_s1] sm:$0xff] (!%p139_p2)   ;;  %s852_s16 = sshll.u32 (!%p139_p2), %s847_s13, 5  ;;  %v1139_v1 = vld [vmem:[%s1318_s1 + $0x8] sm:$0xff] (!%p139_p2)   ;;  %v1140_v2 = vld [vmem:[%s1318_s1 + $0x10] sm:$0xff] (!%p139_p2)  }
   0x6   : > { %142 = sbr.rel (%p139_p2) target bundleno = 293 (0x125), region = 32  ;;  %p163_p3 = scmp.lt.s32.totalorder (!%p139_p2), %s852_s16, 63  ;;  %1066 = vmatprep.subr.bf16.mxu0 (!%p139_p2), %v1138_v0  ;;  %1114 = vmatprep.subr.bf16.mxu1 (!%p139_p2), %v1138_v0  ;;  %v1141_v3 = vld [vmem:[%s1318_s1 + $0x18] sm:$0xff] (!%p139_p2)   ;;  %v1142_v6 = vld [vmem:[%s1318_s1 + $0x20] sm:$0xff] (!%p139_p2)   ;;  %v1143_v7 = vld [vmem:[%s1318_s1 + $0x28] sm:$0xff] (!%p139_p2)  }
   0x7   : > { %1067 = vmatpush3.bf16.msra.mxu0 (!%p139_p2), %v1138_v0  ;;  %1122 = vmatpush3.bf16.msra.mxu1 (!%p139_p2), %v1138_v0  ;;  %v1144_v8 = vld [vmem:[%s1318_s1 + $0x30] sm:$0xff] (!%p139_p2)   ;;  %v1145_v9 = vld [vmem:[%s1318_s1 + $0x38] sm:$0xff] (!%p139_p2)   ;;  %v1251_v24 = vld [vmem:[%s1319_s2] ss:$0 sm:$0xff] (!%p139_p2) }
   0x8   : > { %1068 = vmatprep.subr.bf16.mxu0 (!%p139_p2), %v1139_v1  ;;  %1115 = vmatprep.subr.bf16.mxu1 (!%p139_p2), %v1139_v1 }
   0xb   : > { %1069 = vmatpush3.bf16.msra.mxu0 (!%p139_p2), %v1139_v1  ;;  %1123 = vmatpush3.bf16.msra.mxu1 (!%p139_p2), %v1139_v1 }
   0xc   : > { %1070 = vmatprep.subr.bf16.mxu0 (!%p139_p2), %v1140_v2  ;;  %1116 = vmatprep.subr.bf16.mxu1 (!%p139_p2), %v1140_v2 }
   0xd   : > { %s1322_s16 = smov (!%p163_p3, %s852_s16), 63 }
   0xe   : > { %s853_s21 = sshll.u32 %s1322_s16, 2 }
   0xf   : > { %s1215_s24 = scalar_lea.vmem %s1317_s0, %s853_s21  ;;  %1071 = vmatpush3.bf16.msra.mxu0 %v1140_v2  ;;  %1124 = vmatpush3.bf16.msra.mxu1 %v1140_v2  ;;  %s1268_s13 = scalar_lea.vmem %s1320_s3, %s853_s21 }
  0x10   : > { %v1146_v4 = vld [vmem:[%s1215_s24] sm:$0xff]   ;;  %1072 = vmatprep.subr.bf16.mxu0 %v1141_v3  ;;  %1117 = vmatprep.subr.bf16.mxu1 %v1141_v3  ;;  %v1148_v10 = vld [vmem:[%s1215_s24 + $0x8] sm:$0xff]   ;;  %v1150_v12 = vld [vmem:[%s1215_s24 + $0x10] sm:$0xff]  }
  0x11   : > { %v1147_v5 = vld [vmem:[%s1215_s24 + $0x40] sm:$0xff]   ;;  %1082 = vmatprep.mubr.bf16.mxu0 %v1146_v4  ;;  %v1149_v11 = vld [vmem:[%s1215_s24 + $0x48] sm:$0xff]   ;;  %v1151_v13 = vld [vmem:[%s1215_s24 + $0x50] sm:$0xff]  }
  0x12   : > { %1098 = vmatprep.mubr.bf16.mxu1 %v1147_v5  ;;  %v1152_v14 = vld [vmem:[%s1215_s24 + $0x18] sm:$0xff]   ;;  %v1154_v16 = vld [vmem:[%s1215_s24 + $0x20] sm:$0xff]   ;;  %v1156_v18 = vld [vmem:[%s1215_s24 + $0x28] sm:$0xff]  }
  0x13   : > { %1073 = vmatpush3.bf16.msra.mxu0 %v1141_v3  ;;  %1125 = vmatpush3.bf16.msra.mxu1 %v1141_v3  ;;  %v1153_v15 = vld [vmem:[%s1215_s24 + $0x58] sm:$0xff]   ;;  %v1155_v17 = vld [vmem:[%s1215_s24 + $0x60] sm:$0xff]   ;;  %v1157_v19 = vld [vmem:[%s1215_s24 + $0x68] sm:$0xff]  }
  0x14   : > { %1074 = vmatprep.subr.bf16.mxu0 %v1142_v6  ;;  %1118 = vmatprep.subr.bf16.mxu1 %v1142_v6  ;;  %v1158_v20 = vld [vmem:[%s1215_s24 + $0x30] sm:$0xff]   ;;  %v1160_v22 = vld [vmem:[%s1215_s24 + $0x38] sm:$0xff]  }
  0x15   : > { %v1159_v21 = vld [vmem:[%s1215_s24 + $0x70] sm:$0xff]   ;;  %v1161_v23 = vld [vmem:[%s1215_s24 + $0x78] sm:$0xff]  }
  0x17   : > { %1075 = vmatpush3.bf16.msra.mxu0 %v1142_v6  ;;  %1126 = vmatpush3.bf16.msra.mxu1 %v1142_v6 }
  0x18   : > { %1076 = vmatprep.subr.bf16.mxu0 %v1143_v7  ;;  %1119 = vmatprep.subr.bf16.mxu1 %v1143_v7 }
  0x1b   : > { %1077 = vmatpush3.bf16.msra.mxu0 %v1143_v7  ;;  %1127 = vmatpush3.bf16.msra.mxu1 %v1143_v7 }
  0x1c   : > { %1078 = vmatprep.subr.bf16.mxu0 %v1144_v8  ;;  %1120 = vmatprep.subr.bf16.mxu1 %v1144_v8 }
  0x1f   : > { %1079 = vmatpush3.bf16.msra.mxu0 %v1144_v8  ;;  %1128 = vmatpush3.bf16.msra.mxu1 %v1144_v8 }
  0x20   : > { %1080 = vmatprep.subr.bf16.mxu0 %v1145_v9  ;;  %1121 = vmatprep.subr.bf16.mxu1 %v1145_v9 }
  0x23   : > { %1081 = vmatpush3.bf16.msra.mxu0 %v1145_v9  ;;  %1129 = vmatpush3.bf16.msra.mxu1 %v1145_v9 }
  0x26   : > { %1083 = vmatmul.mubr.bf16.vlgmr.msra.gmra.mrb[0].mxu0 %v1148_v10  ;;  %1099 = vmatmul.mubr.bf16.vlgmr.msra.gmra.mrb[0].mxu1 %v1149_v11 }
  0x27   : > { %1086 = vmatprep.mubr.bf16.mxu0 %v1150_v12  ;;  %1102 = vmatprep.mubr.bf16.mxu1 %v1151_v13 }
  0x2e   : > { %1087 = vmatmul.mubr.bf16.gmra.mrb[4].mxu0 %v1152_v14  ;;  %1103 = vmatmul.mubr.bf16.gmra.mrb[4].mxu1 %v1153_v15 }
  0x2f   : > { %1090 = vmatprep.mubr.bf16.mxu0 %v1154_v16  ;;  %1106 = vmatprep.mubr.bf16.mxu1 %v1155_v17 }
  0x36   : > { %1091 = vmatmul.mubr.bf16.gmra.mrb[8].mxu0 %v1156_v18  ;;  %1107 = vmatmul.mubr.bf16.gmra.mrb[8].mxu1 %v1157_v19 }
  0x37   : > { %1094 = vmatprep.mubr.bf16.mxu0 %v1158_v20  ;;  %1110 = vmatprep.mubr.bf16.mxu1 %v1159_v21 }
  0x3e   : > { %1095 = vmatmul.mubr.bf16.gmra.mrb[12].mxu0 %v1160_v22  ;;  %1111 = vmatmul.mubr.bf16.gmra.mrb[12].mxu1 %v1161_v23 }
  0xf9   : > { %v1084_v25 = vpop.f32.mrb[0].mxu0  ;;  %v1100_v26 = vpop.f32.mrb[0].mxu1 }
  0xfa   : > { %v417_v27 = vadd.f32 %v1084_v25, %v1251_v24  ;;  %v481_v28 = vadd.f32 %v1100_v26, %v1251_v24  ;;  %v408_v29 = vpop.f32.mrb[1].mxu0  ;;  %v472_v30 = vpop.f32.mrb[1].mxu1 }
  0xfb   : > { %v409_v31 = vadd.f32 %v1251_v24, %v408_v29  ;;  %v473_v32 = vadd.f32 %v1251_v24, %v472_v30  ;;  %v1085_v33 = vpop.f32.mrb[2].mxu0  ;;  %v1101_v34 = vpop.f32.mrb[2].mxu1 }
  0xfc   : > { %vm537_vm0 = vcmp.gt.f32.partialorder %v417_v27, 0.0  ;;  %v569_v35 = vmul.f32 0.2, %v417_v27  ;;  %vm553_vm1 = vcmp.gt.f32.partialorder %v481_v28, 0.0  ;;  %v585_v36 = vmul.f32 0.2, %v481_v28 }
  0xfd   : > { %vm535_vm2 = vcmp.gt.f32.partialorder %v409_v31, 0.0  ;;  %v567_v37 = vmul.f32 0.2, %v409_v31  ;;  %vm551_vm3 = vcmp.gt.f32.partialorder %v473_v32, 0.0  ;;  %v583_v38 = vmul.f32 0.2, %v473_v32 }
  0xfe   : > { %v420_v39 = vadd.f32 %v1085_v33, %v1251_v24  ;;  %v484_v40 = vadd.f32 %v1101_v34, %v1251_v24  ;;  %v411_v41 = vpop.f32.mrb[3].mxu0  ;;  %v475_v42 = vpop.f32.mrb[3].mxu1  ;;  %v601_v43 = vsel %vm537_vm0, %v417_v27, %v569_v35  ;;  %v617_v44 = vsel %vm553_vm1, %v481_v28, %v585_v36 }
  0xff   : > { %v412_v45 = vadd.f32 %v1251_v24, %v411_v41  ;;  %v476_v46 = vadd.f32 %v1251_v24, %v475_v42  ;;  %v599_v51 = vsel %vm535_vm2, %v409_v31, %v567_v37  ;;  %v615_v52 = vsel %vm551_vm3, %v473_v32, %v583_v38 }
 0x100   : > { %vm538_vm4 = vcmp.gt.f32.partialorder %v420_v39, 0.0  ;;  %v570_v47 = vmul.f32 0.2, %v420_v39  ;;  %vm554_vm5 = vcmp.gt.f32.partialorder %v484_v40, 0.0  ;;  %v586_v48 = vmul.f32 0.2, %v484_v40 }
 0x101   : > { %vm536_vm6 = vcmp.gt.f32.partialorder %v412_v45, 0.0  ;;  %v568_v49 = vmul.f32 0.2, %v412_v45  ;;  %vm552_vm7 = vcmp.gt.f32.partialorder %v476_v46, 0.0  ;;  %v584_v50 = vmul.f32 0.2, %v476_v46 }
 0x102   : > { %v602_v53 = vsel %vm538_vm4, %v420_v39, %v570_v47  ;;  %v618_v54 = vsel %vm554_vm5, %v484_v40, %v586_v48  ;;  %v1088_v55 = vpop.f32.mrb[4].mxu0  ;;  %v1104_v56 = vpop.f32.mrb[4].mxu1 }
 0x103   : > { %v955_v57 = vpack.c.bf16 %v602_v53, %v601_v43  ;;  %v995_v58 = vpack.c.bf16 %v618_v54, %v617_v44  ;;  %v600_v59 = vsel %vm536_vm6, %v412_v45, %v568_v49  ;;  %v616_v60 = vsel %vm552_vm7, %v476_v46, %v584_v50  ;;  %v424_v61 = vpop.f32.mrb[5].mxu0  ;;  %v488_v62 = vpop.f32.mrb[5].mxu1 }
 0x104   : > { %v950_v63 = vpack.c.bf16 %v600_v59, %v599_v51  ;;  %v990_v0 = vpack.c.bf16 %v616_v60, %v615_v52  ;;  %v433_v1 = vadd.f32 %v1088_v55, %v1251_v24  ;;  %v497_v2 = vadd.f32 %v1104_v56, %v1251_v24  ;;  %v1089_v3 = vpop.f32.mrb[6].mxu0  ;;  %v1105_v4 = vpop.f32.mrb[6].mxu1 }
 0x105   : > { %1027 = vst [vmem:[%s1268_s13 + $0x8] sm:$0xff] %v955_v57   ;;  %1035 = vst [vmem:[%s1268_s13 + $0x48] sm:$0xff] %v995_v58   ;;  %v425_v5 = vadd.f32 %v1251_v24, %v424_v61  ;;  %v489_v6 = vadd.f32 %v1251_v24, %v488_v62  ;;  %v436_v7 = vadd.f32 %v1089_v3, %v1251_v24  ;;  %v427_v9 = vpop.f32.mrb[7].mxu0  ;;  %v491_v10 = vpop.f32.mrb[7].mxu1 }
 0x106   : > { %v500_v8 = vadd.f32 %v1105_v4, %v1251_v24  ;;  %951 = vst [vmem:[%s1268_s13] sm:$0xff] %v950_v63   ;;  %1034 = vst [vmem:[%s1268_s13 + $0x40] sm:$0xff] %v990_v0   ;;  %vm541_vm8 = vcmp.gt.f32.partialorder %v433_v1, 0.0  ;;  %v573_v11 = vmul.f32 0.2, %v433_v1  ;;  %vm557_vm9 = vcmp.gt.f32.partialorder %v497_v2, 0.0 }
 0x107   : > { %v589_v12 = vmul.f32 0.2, %v497_v2  ;;  %vm539_vm10 = vcmp.gt.f32.partialorder %v425_v5, 0.0  ;;  %v571_v13 = vmul.f32 0.2, %v425_v5  ;;  %vm555_vm11 = vcmp.gt.f32.partialorder %v489_v6, 0.0 }
 0x108   : > { %v605_v14 = vsel %vm541_vm8, %v433_v1, %v573_v11  ;;  %v587_v15 = vmul.f32 0.2, %v489_v6  ;;  %vm542_vm12 = vcmp.gt.f32.partialorder %v436_v7, 0.0  ;;  %v574_v16 = vmul.f32 0.2, %v436_v7 }
 0x109   : > { %v621_v17 = vsel %vm557_vm9, %v497_v2, %v589_v12  ;;  %v603_v18 = vsel %vm539_vm10, %v425_v5, %v571_v13  ;;  %vm558_vm13 = vcmp.gt.f32.partialorder %v500_v8, 0.0  ;;  %v590_v19 = vmul.f32 0.2, %v500_v8  ;;  %v1092_v20 = vpop.f32.mrb[8].mxu0  ;;  %v1108_v21 = vpop.f32.mrb[8].mxu1 }
 0x10a   : > { %v606_v22 = vsel %vm542_vm12, %v436_v7, %v574_v16  ;;  %v428_v23 = vadd.f32 %v1251_v24, %v427_v9  ;;  %v492_v25 = vadd.f32 %v1251_v24, %v491_v10  ;;  %v449_v26 = vadd.f32 %v1092_v20, %v1251_v24  ;;  %v440_v27 = vpop.f32.mrb[9].mxu0  ;;  %v504_v28 = vpop.f32.mrb[9].mxu1 }
 0x10b   : > { %v965_v29 = vpack.c.bf16 %v606_v22, %v605_v14  ;;  %v622_v30 = vsel %vm558_vm13, %v500_v8, %v590_v19  ;;  %v513_v31 = vadd.f32 %v1108_v21, %v1251_v24  ;;  %v441_v32 = vadd.f32 %v1251_v24, %v440_v27  ;;  %v1093_v33 = vpop.f32.mrb[10].mxu0  ;;  %v1109_v34 = vpop.f32.mrb[10].mxu1 }
 0x10c   : > { %v1005_v35 = vpack.c.bf16 %v622_v30, %v621_v17  ;;  %vm540_vm14 = vcmp.gt.f32.partialorder %v428_v23, 0.0  ;;  %v572_v36 = vmul.f32 0.2, %v428_v23  ;;  %vm556_vm15 = vcmp.gt.f32.partialorder %v492_v25, 0.0  ;;  %v443_v37 = vpop.f32.mrb[11].mxu0  ;;  %v507_v38 = vpop.f32.mrb[11].mxu1 }
 0x10d   : > { %1029 = vst [vmem:[%s1268_s13 + $0x18] sm:$0xff] %v965_v29   ;;  %v588_v39 = vmul.f32 0.2, %v492_v25  ;;  %vm545_vm0 = vcmp.gt.f32.partialorder %v449_v26, 0.0  ;;  %v577_v40 = vmul.f32 0.2, %v449_v26  ;;  %v619_v41 = vsel %vm555_vm11, %v489_v6, %v587_v15 }
 0x10e   : > { %vm561_vm1 = vcmp.gt.f32.partialorder %v513_v31, 0.0  ;;  %1037 = vst [vmem:[%s1268_s13 + $0x58] sm:$0xff] %v1005_v35   ;;  %v604_v42 = vsel %vm540_vm14, %v428_v23, %v572_v36  ;;  %v593_v43 = vmul.f32 0.2, %v513_v31  ;;  %vm543_vm2 = vcmp.gt.f32.partialorder %v441_v32, 0.0 }
 0x10f   : > { %v960_v44 = vpack.c.bf16 %v604_v42, %v603_v18  ;;  %v620_v45 = vsel %vm556_vm15, %v492_v25, %v588_v39  ;;  %v575_v46 = vmul.f32 0.2, %v441_v32  ;;  %v505_v47 = vadd.f32 %v1251_v24, %v504_v28 }
 0x110   : > { %v1000_v48 = vpack.c.bf16 %v620_v45, %v619_v41  ;;  %v609_v49 = vsel %vm545_vm0, %v449_v26, %v577_v40  ;;  %v625_v50 = vsel %vm561_vm1, %v513_v31, %v593_v43  ;;  %v452_v51 = vadd.f32 %v1093_v33, %v1251_v24 }
 0x111   : > { %1028 = vst [vmem:[%s1268_s13 + $0x10] sm:$0xff] %v960_v44   ;;  %vm559_vm3 = vcmp.gt.f32.partialorder %v505_v47, 0.0  ;;  %v591_v52 = vmul.f32 0.2, %v505_v47  ;;  %v516_v53 = vadd.f32 %v1109_v34, %v1251_v24  ;;  %v444_v54 = vadd.f32 %v1251_v24, %v443_v37  ;;  %v1096_v55 = vpop.f32.mrb[12].mxu0  ;;  %v1112_v56 = vpop.f32.mrb[12].mxu1 }
 0x112   : > { %1036 = vst [vmem:[%s1268_s13 + $0x50] sm:$0xff] %v1000_v48   ;;  %vm546_vm4 = vcmp.gt.f32.partialorder %v452_v51, 0.0  ;;  %v578_v57 = vmul.f32 0.2, %v452_v51  ;;  %v508_v58 = vadd.f32 %v1251_v24, %v507_v38  ;;  %v465_v59 = vadd.f32 %v1096_v55, %v1251_v24  ;;  %v456_v60 = vpop.f32.mrb[13].mxu0  ;;  %v520_v61 = vpop.f32.mrb[13].mxu1 }
 0x113   : > { %v607_v62 = vsel %vm543_vm2, %v441_v32, %v575_v46  ;;  %vm562_vm5 = vcmp.gt.f32.partialorder %v516_v53, 0.0  ;;  %v594_v63 = vmul.f32 0.2, %v516_v53  ;;  %vm544_vm6 = vcmp.gt.f32.partialorder %v444_v54, 0.0  ;;  %v1097_v0 = vpop.f32.mrb[14].mxu0  ;;  %v1113_v1 = vpop.f32.mrb[14].mxu1 }
 0x114   : > { %v610_v2 = vsel %vm546_vm4, %v452_v51, %v578_v57  ;;  %v576_v3 = vmul.f32 0.2, %v444_v54  ;;  %vm560_vm7 = vcmp.gt.f32.partialorder %v508_v58, 0.0  ;;  %v592_v4 = vmul.f32 0.2, %v508_v58  ;;  %v459_v5 = vpop.f32.mrb[15].mxu0 }
 0x115   : > { %v623_v6 = vsel %vm559_vm3, %v505_v47, %v591_v52  ;;  %v975_v7 = vpack.c.bf16 %v610_v2, %v609_v49  ;;  %v626_v8 = vsel %vm562_vm5, %v516_v53, %v594_v63  ;;  %v581_v9 = vmul.f32 0.2, %v465_v59  ;;  %v523_v10 = vpop.f32.mrb[15].mxu1 }
 0x116   : > { %v1015_v11 = vpack.c.bf16 %v626_v8, %v625_v50  ;;  %v608_v12 = vsel %vm544_vm6, %v444_v54, %v576_v3  ;;  %v624_v13 = vsel %vm560_vm7, %v508_v58, %v592_v4  ;;  %v529_v14 = vadd.f32 %v1112_v56, %v1251_v24 }
 0x117   : > { %1031 = vst [vmem:[%s1268_s13 + $0x28] sm:$0xff] %v975_v7   ;;  %v970_v15 = vpack.c.bf16 %v608_v12, %v607_v62  ;;  %v1010_v16 = vpack.c.bf16 %v624_v13, %v623_v6  ;;  %vm549_vm8 = vcmp.gt.f32.partialorder %v465_v59, 0.0  ;;  %v457_v17 = vadd.f32 %v1251_v24, %v456_v60 }
 0x118   : > { %1039 = vst [vmem:[%s1268_s13 + $0x68] sm:$0xff] %v1015_v11   ;;  %vm565_vm9 = vcmp.gt.f32.partialorder %v529_v14, 0.0  ;;  %v597_v18 = vmul.f32 0.2, %v529_v14  ;;  %v521_v19 = vadd.f32 %v1251_v24, %v520_v61  ;;  %v468_v20 = vadd.f32 %v1097_v0, %v1251_v24 }
 0x119   : > { %1030 = vst [vmem:[%s1268_s13 + $0x20] sm:$0xff] %v970_v15   ;;  %1038 = vst [vmem:[%s1268_s13 + $0x60] sm:$0xff] %v1010_v16   ;;  %v579_v21 = vmul.f32 0.2, %v457_v17  ;;  %v532_v22 = vadd.f32 %v1113_v1, %v1251_v24  ;;  %v460_v23 = vadd.f32 %v1251_v24, %v459_v5  ;;  %v613_v25 = vsel %vm549_vm8, %v465_v59, %v581_v9 }
 0x11a   : > { %vm547_vm10 = vcmp.gt.f32.partialorder %v457_v17, 0.0  ;;  %vm550_vm11 = vcmp.gt.f32.partialorder %v468_v20, 0.0  ;;  %v629_v26 = vsel %vm565_vm9, %v529_v14, %v597_v18  ;;  %v582_v27 = vmul.f32 0.2, %v468_v20 }
 0x11b   : > { %vm566_vm12 = vcmp.gt.f32.partialorder %v532_v22, 0.0  ;;  %v598_v28 = vmul.f32 0.2, %v532_v22  ;;  %vm563_vm13 = vcmp.gt.f32.partialorder %v521_v19, 0.0  ;;  %vm548_vm14 = vcmp.gt.f32.partialorder %v460_v23, 0.0 }
 0x11c   : > { %v580_v29 = vmul.f32 0.2, %v460_v23  ;;  %v524_v30 = vadd.f32 %v1251_v24, %v523_v10  ;;  %v611_v31 = vsel %vm547_vm10, %v457_v17, %v579_v21  ;;  %v595_v32 = vmul.f32 0.2, %v521_v19 }
 0x11d   : > { %v614_v33 = vsel %vm550_vm11, %v468_v20, %v582_v27  ;;  %v630_v34 = vsel %vm566_vm12, %v532_v22, %v598_v28 }
 0x11e   : > { %v985_v35 = vpack.c.bf16 %v614_v33, %v613_v25  ;;  %v1025_v36 = vpack.c.bf16 %v630_v34, %v629_v26  ;;  %v612_v37 = vsel %vm548_vm14, %v460_v23, %v580_v29  ;;  %vm564_vm15 = vcmp.gt.f32.partialorder %v524_v30, 0.0 }
 0x11f   : > { %v980_v38 = vpack.c.bf16 %v612_v37, %v611_v31  ;;  %v596_v39 = vmul.f32 0.2, %v524_v30  ;;  %v627_v40 = vsel %vm563_vm13, %v521_v19, %v595_v32 }
 0x120   : > { %1033 = vst [vmem:[%s1268_s13 + $0x38] sm:$0xff] %v985_v35   ;;  %1041 = vst [vmem:[%s1268_s13 + $0x78] sm:$0xff] %v1025_v36  }
 0x121   : > { %1032 = vst [vmem:[%s1268_s13 + $0x30] sm:$0xff] %v980_v38   ;;  %v628_v41 = vsel %vm564_vm15, %v524_v30, %v596_v39 }
 0x122   : > { %v1020_v42 = vpack.c.bf16 %v628_v41, %v627_v40 }
 0x124   : > { %1040 = vst [vmem:[%s1268_s13 + $0x70] sm:$0xff] %v1020_v42  }
 0x125 PF: > { %s13_s12 = sadd.s32 1, %s1168_s12  }
 0x126   : > { %p10_p4 = scmp.ge.s32.totalorder %s13_s12, 4  }
 0x128   :  { %12 = sbr.rel (!%p10_p4) target bundleno = 1 (0x1), region = 62 }

// kernel: discriminator_forward.5
= control target key start
LH: loop header
LB: loop body
LE: loop exit
PB: predicated region body
PF: predicated region fallthrough
CT: control target
= control target key end

     0   :  { %s839_s18 = smov 0   ;;  %s927_s0 = inlined_call_operand.vmem [shape: bf16[128,256], index: 0, kind: input, shape index: {}]   ;;  %s928_s1 = inlined_call_operand.vmem [shape: bf16[256,128], index: 1, kind: input, shape index: {}]   ;;  %s929_s2 = inlined_call_operand.vmem [shape: f32[1,128], index: 2, kind: input, shape index: {}]   ;;  %s930_s3 = inlined_call_operand.vmem [shape: f32[1,128], index: 3, kind: input, shape index: {}]   ;;  %s931_s4 = inlined_call_operand.vmem [shape: f32[1,128], index: 4, kind: input, shape index: {}]   ;;  %s932_s5 = inlined_call_operand.vmem [shape: bf16[128,128], index: 5, kind: output, shape index: {}]  }
   0x1 LB: > { %s630_s19 = sadd.s32 4294967295, %s807_s18   ;;  %p634_p0 = scmp.ge.s32.totalorder %s807_s18, 1  ;;  %s807_s18 = sphi %s839_s18, %s15_s18  }
   0x2   : > { %p189_p1 = scmp.lt.s32.totalorder %s807_s18, 3 }
   0x4   : > { %p190_p2 = pnand %p634_p0, %p189_p1 }
   0x5   : > { %v773_v0 = vld [vmem:[%s928_s1 + $0x40] sm:$0xff] (!%p190_p2)   ;;  %s635_s22 = sshll.u32 (!%p190_p2), %s630_s19, 3  ;;  %v775_v2 = vld [vmem:[%s928_s1 + $0x48] sm:$0xff] (!%p190_p2)   ;;  %v777_v4 = vld [vmem:[%s928_s1 + $0x50] sm:$0xff] (!%p190_p2)  }
   0x6   : > { %193 = sbr.rel (%p190_p2) target bundleno = 277 (0x115), region = 40  ;;  %v774_v1 = vld [vmem:[%s928_s1] sm:$0xff] (!%p190_p2)   ;;  %709 = vmatprep.subr.bf16.mxu0 (!%p190_p2), %v773_v0  ;;  %749 = vmatprep.subr.bf16.mxu1 (!%p190_p2), %v773_v0  ;;  %v776_v3 = vld [vmem:[%s928_s1 + $0x8] sm:$0xff] (!%p190_p2)   ;;  %p219_p3 = scmp.lt.s32.totalorder (!%p190_p2), %s635_s22, 15  ;;  %v778_v5 = vld [vmem:[%s928_s1 + $0x10] sm:$0xff] (!%p190_p2)  }
   0x7   : > { %710 = vmatpush3.bf16.msra.mxu0 (!%p190_p2), %v774_v1  ;;  %757 = vmatpush3.bf16.msra.mxu1 (!%p190_p2), %v774_v1  ;;  %v779_v6 = vld [vmem:[%s928_s1 + $0x58] sm:$0xff] (!%p190_p2)   ;;  %v781_v8 = vld [vmem:[%s928_s1 + $0x60] sm:$0xff] (!%p190_p2)   ;;  %v783_v10 = vld [vmem:[%s928_s1 + $0x68] sm:$0xff] (!%p190_p2)  }
   0x8   : > { %711 = vmatprep.subr.bf16.mxu0 (!%p190_p2), %v775_v2  ;;  %750 = vmatprep.subr.bf16.mxu1 (!%p190_p2), %v775_v2  ;;  %v780_v7 = vld [vmem:[%s928_s1 + $0x18] sm:$0xff] (!%p190_p2)   ;;  %v782_v9 = vld [vmem:[%s928_s1 + $0x20] sm:$0xff] (!%p190_p2)   ;;  %v784_v13 = vld [vmem:[%s928_s1 + $0x28] sm:$0xff] (!%p190_p2)  }
   0x9   : > { %v785_v14 = vld [vmem:[%s928_s1 + $0x70] sm:$0xff] (!%p190_p2)   ;;  %v787_v16 = vld [vmem:[%s928_s1 + $0x78] sm:$0xff] (!%p190_p2)   ;;  %v640_v26 = vld [vmem:[%s929_s2] ss:$0 sm:$0xff] (!%p190_p2) }
   0xa   : > { %v786_v15 = vld [vmem:[%s928_s1 + $0x30] sm:$0xff] (!%p190_p2)   ;;  %v788_v17 = vld [vmem:[%s928_s1 + $0x38] sm:$0xff] (!%p190_p2)   ;;  %v665_v39 = vld [vmem:[%s930_s3] ss:$0 sm:$0xff] (!%p190_p2) }
   0xb   : > { %712 = vmatpush3.bf16.msra.mxu0 (!%p190_p2), %v776_v3  ;;  %758 = vmatpush3.bf16.msra.mxu1 (!%p190_p2), %v776_v3  ;;  %v666_v45 = vld [vmem:[%s931_s4] ss:$0 sm:$0xff] (!%p190_p2) }
   0xc   : > { %713 = vmatprep.subr.bf16.mxu0 (!%p190_p2), %v777_v4  ;;  %751 = vmatprep.subr.bf16.mxu1 (!%p190_p2), %v777_v4 }
   0xd   : > { %s934_s22 = smov (!%p219_p3, %s635_s22), 15 }
   0xe   : > { %s677_s12 = sshll.u32 %s934_s22, 3  ;;  %s639_s15 = sshll.u32 %s934_s22, 2 }
   0xf   : > { %714 = vmatpush3.bf16.msra.mxu0 %v778_v5  ;;  %759 = vmatpush3.bf16.msra.mxu1 %v778_v5  ;;  %s880_s17 = scalar_lea.vmem %s927_s0, %s677_s12  ;;  %s229_s19 = scalar_lea.vmem %s932_s5, %s639_s15 }
  0x10   : > { %715 = vmatprep.subr.bf16.mxu0 %v779_v6  ;;  %752 = vmatprep.subr.bf16.mxu1 %v779_v6  ;;  %v791_v11 = vld [vmem:[%s880_s17 + $0x4] ss:$8 sps:$4 sm:$0xff]   ;;  %v789_v18 = vld [vmem:[%s880_s17] ss:$8 sps:$4 sm:$0xff]   ;;  %v795_v20 = vld [vmem:[%s880_s17 + $0x14] ss:$8 sps:$4 sm:$0xff]  }
  0x11   : > { %v794_v12 = vld [vmem:[%s880_s17 + $0x24] ss:$8 sps:$4 sm:$0xff]   ;;  %447 = vmatprep.mubr.bf16.mxu0 %v791_v11  ;;  %v792_v19 = vld [vmem:[%s880_s17 + $0x20] ss:$8 sps:$4 sm:$0xff]   ;;  %v797_v21 = vld [vmem:[%s880_s17 + $0x34] ss:$8 sps:$4 sm:$0xff]  }
  0x12   : > { %463 = vmatprep.mubr.bf16.mxu1 %v794_v12  ;;  %v799_v22 = vld [vmem:[%s880_s17 + $0x10] ss:$8 sps:$4 sm:$0xff]  }
  0x13   : > { %716 = vmatpush3.bf16.msra.mxu0 %v780_v7  ;;  %760 = vmatpush3.bf16.msra.mxu1 %v780_v7  ;;  %v800_v23 = vld [vmem:[%s880_s17 + $0x30] ss:$8 sps:$4 sm:$0xff]  }
  0x14   : > { %717 = vmatprep.subr.bf16.mxu0 %v781_v8  ;;  %753 = vmatprep.subr.bf16.mxu1 %v781_v8 }
  0x17   : > { %718 = vmatpush3.bf16.msra.mxu0 %v782_v9  ;;  %761 = vmatpush3.bf16.msra.mxu1 %v782_v9 }
  0x18   : > { %719 = vmatprep.subr.bf16.mxu0 %v783_v10  ;;  %754 = vmatprep.subr.bf16.mxu1 %v783_v10 }
  0x1b   : > { %720 = vmatpush3.bf16.msra.mxu0 %v784_v13  ;;  %762 = vmatpush3.bf16.msra.mxu1 %v784_v13 }
  0x1c   : > { %721 = vmatprep.subr.bf16.mxu0 %v785_v14  ;;  %755 = vmatprep.subr.bf16.mxu1 %v785_v14 }
  0x1f   : > { %722 = vmatpush3.bf16.msra.mxu0 %v786_v15  ;;  %763 = vmatpush3.bf16.msra.mxu1 %v786_v15 }
  0x20   : > { %723 = vmatprep.subr.bf16.mxu0 %v787_v16  ;;  %756 = vmatprep.subr.bf16.mxu1 %v787_v16 }
  0x23   : > { %724 = vmatpush3.bf16.msra.mxu0 %v788_v17  ;;  %764 = vmatpush3.bf16.msra.mxu1 %v788_v17 }
  0x26   : > { %448 = vmatmul.mubr.bf16.vlgmr.msra.gmra.mrb[0].mxu0 %v789_v18  ;;  %464 = vmatmul.mubr.bf16.vlgmr.msra.gmra.mrb[0].mxu1 %v792_v19 }
  0x27   : > { %455 = vmatprep.mubr.bf16.mxu0 %v795_v20  ;;  %471 = vmatprep.mubr.bf16.mxu1 %v797_v21 }
  0x2e   : > { %456 = vmatmul.mubr.bf16.gmra.mrb[4].mxu0 %v799_v22  ;;  %472 = vmatmul.mubr.bf16.gmra.mrb[4].mxu1 %v800_v23 }
  0xf9   : > { %v725_v24 = vpop.f32.mrb[0].mxu0  ;;  %v737_v25 = vpop.f32.mrb[0].mxu1 }
  0xfa   : > { %v726_v27 = vpop.f32.mrb[1].mxu0  ;;  %v738_v28 = vpop.f32.mrb[1].mxu1 }
  0xfb   : > { %v727_v29 = vadd.f32 %v726_v27, %v725_v24  ;;  %v739_v30 = vadd.f32 %v738_v28, %v737_v25  ;;  %v728_v31 = vpop.f32.mrb[2].mxu0  ;;  %v740_v32 = vpop.f32.mrb[2].mxu1 }
  0xfc   : > { %v729_v33 = vpop.f32.mrb[3].mxu0  ;;  %v741_v34 = vpop.f32.mrb[3].mxu1 }
  0xfd   : > { %v450_v35 = vadd.f32 %v727_v29, %v640_v26  ;;  %v466_v36 = vadd.f32 %v739_v30, %v640_v26  ;;  %v730_v37 = vadd.f32 %v729_v33, %v728_v31  ;;  %v742_v38 = vadd.f32 %v741_v34, %v740_v32 }
  0xff   : > { %vm480_vm0 = vcmp.gt.f32.partialorder %v450_v35, 0.0  ;;  %v488_v40 = vmul.f32 0.2, %v450_v35  ;;  %vm484_vm1 = vcmp.gt.f32.partialorder %v466_v36, 0.0  ;;  %v492_v41 = vmul.f32 0.2, %v466_v36 }
 0x100   : > { %v453_v42 = vadd.f32 %v730_v37, %v640_v26  ;;  %v469_v43 = vadd.f32 %v742_v38, %v640_v26 }
 0x101   : > { %v496_v44 = vsel %vm480_vm0, %v450_v35, %v488_v40  ;;  %v500_v46 = vsel %vm484_vm1, %v466_v36, %v492_v41  ;;  %v731_v47 = vpop.f32.mrb[4].mxu0  ;;  %v743_v48 = vpop.f32.mrb[4].mxu1 }
 0x102   : > { %v511_v49 = vmul.f32 %v665_v39, %v496_v44  ;;  %v515_v50 = vmul.f32 %v665_v39, %v500_v46  ;;  %vm481_vm2 = vcmp.gt.f32.partialorder %v453_v42, 0.0  ;;  %v489_v51 = vmul.f32 0.2, %v453_v42  ;;  %v732_v52 = vpop.f32.mrb[5].mxu0  ;;  %v744_v53 = vpop.f32.mrb[5].mxu1 }
 0x103   : > { %vm485_vm3 = vcmp.gt.f32.partialorder %v469_v43, 0.0  ;;  %v493_v54 = vmul.f32 0.2, %v469_v43  ;;  %v733_v55 = vadd.f32 %v732_v52, %v731_v47  ;;  %v745_v56 = vadd.f32 %v744_v53, %v743_v48  ;;  %v734_v57 = vpop.f32.mrb[6].mxu0  ;;  %v746_v58 = vpop.f32.mrb[6].mxu1 }
 0x104   : > { %v526_v59 = vadd.f32 %v666_v45, %v511_v49  ;;  %v497_v60 = vsel %vm481_vm2, %v453_v42, %v489_v51  ;;  %v735_v61 = vpop.f32.mrb[7].mxu0  ;;  %v747_v62 = vpop.f32.mrb[7].mxu1  ;;  %v530_v3 = vadd.f32 %v666_v45, %v515_v50 }
 0x105   : > { %v512_v63 = vmul.f32 %v665_v39, %v497_v60  ;;  %v501_v0 = vsel %vm485_vm3, %v469_v43, %v493_v54  ;;  %v458_v1 = vadd.f32 %v733_v55, %v640_v26  ;;  %v474_v2 = vadd.f32 %v745_v56, %v640_v26 }
 0x106   : > { %v516_v4 = vmul.f32 %v665_v39, %v501_v0  ;;  %v736_v5 = vadd.f32 %v735_v61, %v734_v57  ;;  %v748_v6 = vadd.f32 %v747_v62, %v746_v58 }
 0x107   : > { %v527_v7 = vadd.f32 %v666_v45, %v512_v63  ;;  %vm482_vm4 = vcmp.gt.f32.partialorder %v458_v1, 0.0  ;;  %v490_v8 = vmul.f32 0.2, %v458_v1  ;;  %vm486_vm5 = vcmp.gt.f32.partialorder %v474_v2, 0.0 }
 0x108   : > { %v531_v9 = vadd.f32 %v666_v45, %v516_v4  ;;  %v494_v10 = vmul.f32 0.2, %v474_v2  ;;  %v461_v11 = vadd.f32 %v736_v5, %v640_v26  ;;  %v477_v12 = vadd.f32 %v748_v6, %v640_v26 }
 0x109   : > { %v689_v13 = vpack.c.bf16 %v527_v7, %v526_v59  ;;  %v498_v14 = vsel %vm482_vm4, %v458_v1, %v490_v8 }
 0x10a   : > { %v699_v15 = vpack.c.bf16 %v531_v9, %v530_v3  ;;  %v502_v16 = vsel %vm486_vm5, %v474_v2, %v494_v10  ;;  %vm483_vm6 = vcmp.gt.f32.partialorder %v461_v11, 0.0  ;;  %v491_v17 = vmul.f32 0.2, %v461_v11 }
 0x10b   : > { %690 = vst [vmem:[%s229_s19] sm:$0xff] %v689_v13   ;;  %vm487_vm7 = vcmp.gt.f32.partialorder %v477_v12, 0.0  ;;  %v495_v18 = vmul.f32 0.2, %v477_v12  ;;  %v513_v19 = vmul.f32 %v665_v39, %v498_v14  ;;  %v517_v20 = vmul.f32 %v665_v39, %v502_v16 }
 0x10c   : > { %707 = vst [vmem:[%s229_s19 + $0x10] sm:$0xff] %v699_v15   ;;  %v499_v21 = vsel %vm483_vm6, %v461_v11, %v491_v17 }
 0x10d   : > { %v503_v22 = vsel %vm487_vm7, %v477_v12, %v495_v18  ;;  %v514_v23 = vmul.f32 %v665_v39, %v499_v21  ;;  %v528_v25 = vadd.f32 %v666_v45, %v513_v19  ;;  %v532_v27 = vadd.f32 %v666_v45, %v517_v20 }
 0x10e   : > { %v518_v24 = vmul.f32 %v665_v39, %v503_v22 }
 0x10f   : > { %v529_v28 = vadd.f32 %v666_v45, %v514_v23 }
 0x110   : > { %v533_v26 = vadd.f32 %v666_v45, %v518_v24 }
 0x111   : > { %v694_v29 = vpack.c.bf16 %v529_v28, %v528_v25 }
 0x112   : > { %v704_v30 = vpack.c.bf16 %v533_v26, %v532_v27 }
 0x113   : > { %706 = vst [vmem:[%s229_s19 + $0x8] sm:$0xff] %v694_v29  }
 0x114   : > { %708 = vst [vmem:[%s229_s19 + $0x18] sm:$0xff] %v704_v30  }
 0x115 PF: > { %s15_s18 = sadd.s32 1, %s807_s18  }
 0x116   : > { %p12_p4 = scmp.ge.s32.totalorder %s15_s18, 4  }
 0x118   :  { %14 = sbr.rel (!%p12_p4) target bundleno = 1 (0x1), region = 70 }

// kernel: discriminator_forward.6
= control target key start
LH: loop header
LB: loop body
LE: loop exit
PB: predicated region body
PF: predicated region fallthrough
CT: control target
= control target key end

     0   :  { %s803_s18 = smov 0   ;;  %s905_s0 = inlined_call_operand.vmem [shape: bf16[32,384], index: 0, kind: input, shape index: {}]   ;;  %s906_s1 = inlined_call_operand.vmem [shape: bf16[384,128], index: 1, kind: input, shape index: {}]   ;;  %s907_s2 = inlined_call_operand.vmem [shape: f32[1,128], index: 2, kind: input, shape index: {}]   ;;  %s908_s3 = inlined_call_operand.vmem [shape: f32[1,128], index: 3, kind: input, shape index: {}]   ;;  %s909_s4 = inlined_call_operand.vmem [shape: f32[1,128], index: 4, kind: input, shape index: {}]   ;;  %s910_s5 = inlined_call_operand.vmem [shape: bf16[32,128], index: 5, kind: output, shape index: {}]  }
   0x1 LB: > { %s623_s19 = sadd.s32 4294967295, %s769_s18   ;;  %p627_p0 = scmp.ge.s32.totalorder %s769_s18, 1  ;;  %s769_s18 = sphi %s803_s18, %s15_s18  }
   0x2   : > { %p189_p1 = scmp.lt.s32.totalorder %s769_s18, 3 }
   0x4   : > { %p190_p2 = pnand %p627_p0, %p189_p1 }
   0x5   : > { %v735_v0 = vld [vmem:[%s906_s1 + $0x40] sm:$0xff] (!%p190_p2)   ;;  %v771_v2 = vmov (!%p190_p2), 0.0   ;;  %v738_v4 = vld [vmem:[%s906_s1 + $0x48] sm:$0xff] (!%p190_p2)   ;;  %vm772_vm0 = vmmov (!%p190_p2), 0   ;;  %v741_v7 = vld [vmem:[%s906_s1 + $0x50] sm:$0xff] (!%p190_p2)   ;;  %s628_s9 = sshll.u32 (!%p190_p2), %s623_s19, 1 }
   0x6   : > { %193 = sbr.rel (%p190_p2) target bundleno = 269 (0x10d), region = 40  ;;  %v736_v1 = vld [vmem:[%s906_s1] sm:$0xff] (!%p190_p2)   ;;  %704 = vmatprep.subr.bf16.mxu1 (!%p190_p2), %v771_v2  ;;  %673 = vmatprep.subr.bf16.mxu0 (!%p190_p2), %v735_v0  ;;  %v739_v5 = vld [vmem:[%s906_s1 + $0x8] sm:$0xff] (!%p190_p2)   ;;  %v742_v8 = vld [vmem:[%s906_s1 + $0x10] sm:$0xff] (!%p190_p2)   ;;  %p219_p3 = scmp.lt.s32.totalorder (!%p190_p2), %s628_s9, 3 }
   0x7   : > { %v737_v3 = vld [vmem:[%s906_s1 + $0x80] sm:$0xff] (!%p190_p2)   ;;  %674 = vmatpush3.bf16.msra.mxu0 (!%p190_p2), %v736_v1  ;;  %720 = vmatprep.mubr.msk.bf16.mxu1 (!%p190_p2), %vm772_vm0, %v771_v2  ;;  %v740_v6 = vld [vmem:[%s906_s1 + $0x88] sm:$0xff] (!%p190_p2)   ;;  %v743_v9 = vld [vmem:[%s906_s1 + $0x90] sm:$0xff] (!%p190_p2)  }
   0x8   : > { %705 = vmatpush3.bf16.msra.mxu1 (!%p190_p2), %v737_v3  ;;  %675 = vmatprep.subr.bf16.mxu0 (!%p190_p2), %v738_v4  ;;  %v744_v10 = vld [vmem:[%s906_s1 + $0x58] sm:$0xff] (!%p190_p2)   ;;  %v747_v13 = vld [vmem:[%s906_s1 + $0x60] sm:$0xff] (!%p190_p2)   ;;  %v750_v16 = vld [vmem:[%s906_s1 + $0x68] sm:$0xff] (!%p190_p2)  }
   0x9   : > { %706 = vmatprep.subr.bf16.mxu1 (!%p190_p2), %v771_v2  ;;  %v745_v11 = vld [vmem:[%s906_s1 + $0x18] sm:$0xff] (!%p190_p2)   ;;  %v748_v14 = vld [vmem:[%s906_s1 + $0x20] sm:$0xff] (!%p190_p2)   ;;  %v751_v17 = vld [vmem:[%s906_s1 + $0x28] sm:$0xff] (!%p190_p2)  }
   0xa   : > { %v746_v12 = vld [vmem:[%s906_s1 + $0x98] sm:$0xff] (!%p190_p2)   ;;  %v749_v15 = vld [vmem:[%s906_s1 + $0xa0] sm:$0xff] (!%p190_p2)   ;;  %v752_v18 = vld [vmem:[%s906_s1 + $0xa8] sm:$0xff] (!%p190_p2)  }
   0xb   : > { %676 = vmatpush3.bf16.msra.mxu0 (!%p190_p2), %v739_v5  ;;  %v753_v19 = vld [vmem:[%s906_s1 + $0x70] sm:$0xff] (!%p190_p2)   ;;  %v756_v22 = vld [vmem:[%s906_s1 + $0x78] sm:$0xff] (!%p190_p2)   ;;  %v632_v30 = vld [vmem:[%s907_s2] ss:$0 sm:$0xff] (!%p190_p2) }
   0xc   : > { %707 = vmatpush3.bf16.msra.mxu1 (!%p190_p2), %v740_v6  ;;  %677 = vmatprep.subr.bf16.mxu0 (!%p190_p2), %v741_v7  ;;  %v754_v20 = vld [vmem:[%s906_s1 + $0x30] sm:$0xff] (!%p190_p2)   ;;  %v757_v24 = vld [vmem:[%s906_s1 + $0x38] sm:$0xff] (!%p190_p2)   ;;  %v660_v43 = vld [vmem:[%s908_s3] ss:$0 sm:$0xff] (!%p190_p2) }
   0xd   : > { %708 = vmatprep.subr.bf16.mxu1 %v771_v2  ;;  %s912_s9 = smov (!%p219_p3, %s628_s9), 3  ;;  %v755_v21 = vld [vmem:[%s906_s1 + $0xb0] sm:$0xff]   ;;  %v761_v25 = vld [vmem:[%s906_s1 + $0xb8] sm:$0xff]   ;;  %v661_v48 = vld [vmem:[%s909_s4] ss:$0 sm:$0xff] }
   0xe   : > { %s724_s29 = smul.u32 12, %s912_s9  ;;  %s631_s7 = sshll.u32 %s912_s9, 2 }
   0xf   : > { %678 = vmatpush3.bf16.msra.mxu0 %v742_v8  ;;  %s229_s11 = scalar_lea.vmem %s910_s5, %s631_s7 }
  0x10   : > { %709 = vmatpush3.bf16.msra.mxu1 %v743_v9  ;;  %679 = vmatprep.subr.bf16.mxu0 %v744_v10  ;;  %s223_s16 = scalar_lea.vmem %s905_s0, %s724_s29 }
  0x11   : > { %710 = vmatprep.subr.bf16.mxu1 %v771_v2  ;;  %v760_v23 = vld [vmem:[%s223_s16 + $0x4] ss:$12 sps:$4 sm:$0xff]   ;;  %v758_v26 = vld [vmem:[%s223_s16] ss:$12 sps:$4 sm:$0xff]   ;;  %v762_v27 = vld [vmem:[%s223_s16 + $0x8] ss:$12 sps:$4 sm:$0xff]  }
  0x12   : > { %483 = vmatprep.mubr.bf16.mxu0 %v760_v23 }
  0x13   : > { %680 = vmatpush3.bf16.msra.mxu0 %v745_v11 }
  0x14   : > { %711 = vmatpush3.bf16.msra.mxu1 %v746_v12  ;;  %681 = vmatprep.subr.bf16.mxu0 %v747_v13 }
  0x15   : > { %712 = vmatprep.subr.bf16.mxu1 %v771_v2 }
  0x17   : > { %682 = vmatpush3.bf16.msra.mxu0 %v748_v14 }
  0x18   : > { %713 = vmatpush3.bf16.msra.mxu1 %v749_v15  ;;  %683 = vmatprep.subr.bf16.mxu0 %v750_v16 }
  0x19   : > { %714 = vmatprep.subr.bf16.mxu1 %v771_v2 }
  0x1b   : > { %684 = vmatpush3.bf16.msra.mxu0 %v751_v17 }
  0x1c   : > { %715 = vmatpush3.bf16.msra.mxu1 %v752_v18  ;;  %685 = vmatprep.subr.bf16.mxu0 %v753_v19 }
  0x1d   : > { %716 = vmatprep.subr.bf16.mxu1 %v771_v2 }
  0x1f   : > { %686 = vmatpush3.bf16.msra.mxu0 %v754_v20 }
  0x20   : > { %717 = vmatpush3.bf16.msra.mxu1 %v755_v21  ;;  %687 = vmatprep.subr.bf16.mxu0 %v756_v22 }
  0x21   : > { %718 = vmatprep.subr.bf16.mxu1 %v771_v2 }
  0x23   : > { %688 = vmatpush3.bf16.msra.mxu0 %v757_v24 }
  0x24   : > { %719 = vmatpush3.bf16.msra.mxu1 %v761_v25 }
  0x26   : > { %484 = vmatmul.mubr.bf16.vlgmr.msra.gmra.mrb[0].mxu0 %v758_v26 }
  0x27   : > { %721 = vmatmul.mubr.bf16.vlgmr.msra.gmra.mrb[0].mxu1 %v762_v27 }
  0xf9   : > { %v689_v28 = vpop.f32.mrb[0].mxu0 }
  0xfa   : > { %v690_v29 = vpop.f32.mrb[1].mxu0  ;;  %v526_v31 = vpop.f32.mrb[0].mxu1 }
  0xfb   : > { %v691_v32 = vadd.f32 %v690_v29, %v689_v28  ;;  %v692_v33 = vpop.f32.mrb[2].mxu0  ;;  %v722_v34 = vpop.f32.mrb[1].mxu1 }
  0xfc   : > { %v693_v35 = vpop.f32.mrb[3].mxu0  ;;  %v529_v36 = vpop.f32.mrb[2].mxu1 }
  0xfd   : > { %v486_v37 = vadd.f32 %v691_v32, %v632_v30  ;;  %v694_v38 = vadd.f32 %v693_v35, %v692_v33  ;;  %v723_v39 = vpop.f32.mrb[3].mxu1 }
  0xff   : > { %v527_v40 = vadd.f32 %v526_v31, %v486_v37  ;;  %v489_v41 = vadd.f32 %v694_v38, %v632_v30 }
 0x101   : > { %vm533_vm1 = vcmp.gt.f32.partialorder %v527_v40, 0.0  ;;  %v535_v42 = vmul.f32 0.2, %v527_v40  ;;  %v530_v44 = vadd.f32 %v529_v36, %v489_v41 }
 0x103   : > { %v537_v45 = vsel %vm533_vm1, %v527_v40, %v535_v42  ;;  %vm534_vm2 = vcmp.gt.f32.partialorder %v530_v44, 0.0  ;;  %v536_v46 = vmul.f32 0.2, %v530_v44 }
 0x104   : > { %v546_v47 = vmul.f32 %v660_v43, %v537_v45 }
 0x105   : > { %v538_v49 = vsel %vm534_vm2, %v530_v44, %v536_v46 }
 0x106   : > { %v547_v50 = vmul.f32 %v660_v43, %v538_v49  ;;  %v555_v51 = vadd.f32 %v661_v48, %v546_v47 }
 0x108   : > { %v556_v52 = vadd.f32 %v661_v48, %v547_v50 }
 0x10a   : > { %v671_v53 = vpack.c.bf16 %v556_v52, %v555_v51 }
 0x10c   : > { %672 = vst [vmem:[%s229_s11] sm:$0xff] %v671_v53  }
 0x10d PF: > { %s15_s18 = sadd.s32 1, %s769_s18  }
 0x10e   : > { %p12_p4 = scmp.ge.s32.totalorder %s15_s18, 4  }
 0x110   :  { %14 = sbr.rel (!%p12_p4) target bundleno = 1 (0x1), region = 70 }

// kernel: discriminator_forward.7
= control target key start
LH: loop header
LB: loop body
LE: loop exit
PB: predicated region body
PF: predicated region fallthrough
CT: control target
= control target key end

     0   :  { %v805_v35 = vmov 0.0   ;;  %vm806_vm0 = vmmov 0   ;;  %vm522_vm2 = vcmask 64512   ;;  %vm596_vm3 = vcmask 1041408   ;;  %s1002_s1 = inlined_call_operand.vmem [shape: bf16[640,128], index: 1, kind: input, shape index: {}]   ;;  %s1003_s0 = inlined_call_operand.vmem [shape: bf16[8,640], index: 0, kind: input, shape index: {}]   ;;  %s1004_s2 = inlined_call_operand.vmem [shape: f32[1,128], index: 2, kind: input, shape index: {}]   ;;  %s1005_s3 = inlined_call_operand.vmem [shape: f32[1,128], index: 3, kind: input, shape index: {}]   ;;  %s1006_s4 = inlined_call_operand.vmem [shape: f32[1,128], index: 4, kind: input, shape index: {}]   ;;  %s1007_s5 = inlined_call_operand.vmem [shape: f32[8,128], index: 5, kind: input, shape index: {}]   ;;  %s1008_s6 = inlined_call_operand.vmem [shape: f32[2,8], index: 6, kind: input, shape index: {}]   ;;  %s1009_s7 = inlined_call_operand.<no memory space> [shape: f32[1,1], index: 7, kind: input, shape index: {}]   ;;  %s1010_s8 = inlined_call_operand.vmem [shape: f32[2,1], index: 8, kind: output, shape index: {}]  }
   0x1   :  { %v756_v0 = vld [vmem:[%s1002_s1 + $0x40] sm:$0xff]   ;;  %v760_v4 = vld [vmem:[%s1002_s1 + $0x48] sm:$0xff]   ;;  %v764_v8 = vld [vmem:[%s1002_s1 + $0x50] sm:$0xff]   ;;  %vm618_vm4 = vcmask 1024  }
   0x2   :  { %v757_v1 = vld [vmem:[%s1002_s1] sm:$0xff]   ;;  %674 = vmatprep.subr.bf16.mxu0 %v756_v0  ;;  %v761_v5 = vld [vmem:[%s1002_s1 + $0x8] sm:$0xff]   ;;  %v765_v9 = vld [vmem:[%s1002_s1 + $0x10] sm:$0xff]  }
   0x3   :  { %v758_v2 = vld [vmem:[%s1002_s1 + $0xc0] sm:$0xff]   ;;  %675 = vmatpush3.bf16.msra.mxu0 %v757_v1  ;;  %v762_v6 = vld [vmem:[%s1002_s1 + $0xc8] sm:$0xff]   ;;  %v766_v10 = vld [vmem:[%s1002_s1 + $0xd0] sm:$0xff]  }
   0x4   :  { %v759_v3 = vld [vmem:[%s1002_s1 + $0x80] sm:$0xff]   ;;  %696 = vmatprep.subr.bf16.mxu1 %v758_v2  ;;  %676 = vmatprep.subr.bf16.mxu0 %v760_v4  ;;  %v763_v7 = vld [vmem:[%s1002_s1 + $0x88] sm:$0xff]   ;;  %v767_v11 = vld [vmem:[%s1002_s1 + $0x90] sm:$0xff]  }
   0x5   :  { %697 = vmatpush3.bf16.msra.mxu1 %v759_v3  ;;  %v768_v12 = vld [vmem:[%s1002_s1 + $0x58] sm:$0xff]   ;;  %v772_v16 = vld [vmem:[%s1002_s1 + $0x60] sm:$0xff]   ;;  %v776_v20 = vld [vmem:[%s1002_s1 + $0x68] sm:$0xff]  }
   0x6   :  { %698 = vmatprep.subr.bf16.mxu1 %v762_v6  ;;  %v769_v13 = vld [vmem:[%s1002_s1 + $0x18] sm:$0xff]   ;;  %v773_v17 = vld [vmem:[%s1002_s1 + $0x20] sm:$0xff]   ;;  %v777_v21 = vld [vmem:[%s1002_s1 + $0x28] sm:$0xff]  }
   0x7   :  { %677 = vmatpush3.bf16.msra.mxu0 %v761_v5  ;;  %v770_v14 = vld [vmem:[%s1002_s1 + $0xd8] sm:$0xff]   ;;  %v774_v18 = vld [vmem:[%s1002_s1 + $0xe0] sm:$0xff]   ;;  %v778_v22 = vld [vmem:[%s1002_s1 + $0xe8] sm:$0xff]  }
   0x8   :  { %678 = vmatprep.subr.bf16.mxu0 %v764_v8  ;;  %v771_v15 = vld [vmem:[%s1002_s1 + $0x98] sm:$0xff]   ;;  %v775_v19 = vld [vmem:[%s1002_s1 + $0xa0] sm:$0xff]   ;;  %v779_v23 = vld [vmem:[%s1002_s1 + $0xa8] sm:$0xff]  }
   0x9   :  { %699 = vmatpush3.bf16.msra.mxu1 %v763_v7  ;;  %v780_v24 = vld [vmem:[%s1002_s1 + $0x70] sm:$0xff]   ;;  %v784_v28 = vld [vmem:[%s1002_s1 + $0x78] sm:$0xff]   ;;  %v32_v31 = vld [vmem:[%s1003_s0] sm:$0xff] }
   0xa   :  { %700 = vmatprep.subr.bf16.mxu1 %v766_v10  ;;  %v781_v25 = vld [vmem:[%s1002_s1 + $0x30] sm:$0xff]   ;;  %v785_v29 = vld [vmem:[%s1002_s1 + $0x38] sm:$0xff]   ;;  %v625_v32 = vcombine.low %v32_v31, %v32_v31  ;;  %v626_v33 = vcombine.high %v32_v31, %v32_v31  ;;  %v33_v36 = vld [vmem:[%s1003_s0 + $0x8] sm:$0xff] }
   0xb   :  { %679 = vmatpush3.bf16.msra.mxu0 %v765_v9  ;;  %v782_v26 = vld [vmem:[%s1002_s1 + $0xf0] sm:$0xff]   ;;  %v786_v30 = vld [vmem:[%s1002_s1 + $0xf8] sm:$0xff]   ;;  %v627_v37 = vcombine.low %v33_v36, %v33_v36  ;;  %v628_v38 = vcombine.high %v33_v36, %v33_v36  ;;  %v793_v39 = vld [vmem:[%s1002_s1 + $0x100] sm:$0xff]  }
   0xc   :  { %680 = vmatprep.subr.bf16.mxu0 %v768_v12  ;;  %v783_v27 = vld [vmem:[%s1002_s1 + $0xb0] sm:$0xff]   ;;  %v790_v34 = vld [vmem:[%s1002_s1 + $0xb8] sm:$0xff]   ;;  %412 = vmatprep.mubr.bf16.mxu0 %v626_v33  ;;  %v794_v40 = vld [vmem:[%s1002_s1 + $0x108] sm:$0xff]  }
   0xd   :  { %701 = vmatpush3.bf16.msra.mxu1 %v767_v11  ;;  %452 = vmatprep.mubr.bf16.mxu1 %v628_v38  ;;  %v795_v41 = vld [vmem:[%s1002_s1 + $0x110] sm:$0xff]   ;;  %v796_v42 = vld [vmem:[%s1002_s1 + $0x118] sm:$0xff]   ;;  %v797_v43 = vld [vmem:[%s1002_s1 + $0x120] sm:$0xff]   ;;  %v13_v11 = vstv %s1009_s7 }
   0xe   :  { %702 = vmatprep.subr.bf16.mxu1 %v770_v14  ;;  %v798_v44 = vld [vmem:[%s1002_s1 + $0x128] sm:$0xff]   ;;  %v799_v45 = vld [vmem:[%s1002_s1 + $0x130] sm:$0xff]   ;;  %v800_v46 = vld [vmem:[%s1002_s1 + $0x138] sm:$0xff]   ;;  %14 = vst [vmem:[#allocation2] sm:$0x1] %v13_v11 }
   0xf   :  { %681 = vmatpush3.bf16.msra.mxu0 %v769_v13  ;;  %v789_v47 = vld [vmem:[%s1003_s0 + $0x10] ss:$0 sps:$4 sm:$0xff]   ;;  %v624_v49 = vld [vmem:[%s1004_s2] ss:$0 sm:$0xff] }
  0x10   :  { %682 = vmatprep.subr.bf16.mxu0 %v772_v16  ;;  %v670_v2 = vld [vmem:[%s1005_s3] ss:$0 sm:$0xff] }
  0x11   :  { %703 = vmatpush3.bf16.msra.mxu1 %v771_v15  ;;  %v671_v5 = vld [vmem:[%s1006_s4] ss:$0 sm:$0xff] }
  0x12   :  { %704 = vmatprep.subr.bf16.mxu1 %v774_v18  ;;  %v519_v7 = vld [vmem:[%s1007_s5] sm:$0xff] }
  0x13   :  { %683 = vmatpush3.bf16.msra.mxu0 %v773_v17  ;;  %v521_v10 = vld [vmem:[%s1008_s6] sm:$0x3] }
  0x14   :  { %684 = vmatprep.subr.bf16.mxu0 %v776_v20 }
  0x15   :  { %705 = vmatpush3.bf16.msra.mxu1 %v775_v19  ;;  %v673_v15 = vld [vmem:[#allocation2] ss:$0 sm:$0xff] }
  0x16   :  { %706 = vmatprep.subr.bf16.mxu1 %v778_v22 }
  0x17   :  { %685 = vmatpush3.bf16.msra.mxu0 %v777_v21 }
  0x18   :  { %686 = vmatprep.subr.bf16.mxu0 %v780_v24 }
  0x19   :  { %707 = vmatpush3.bf16.msra.mxu1 %v779_v23 }
  0x1a   :  { %708 = vmatprep.subr.bf16.mxu1 %v782_v26 }
  0x1b   :  { %687 = vmatpush3.bf16.msra.mxu0 %v781_v25 }
  0x1c   :  { %688 = vmatprep.subr.bf16.mxu0 %v784_v28 }
  0x1d   :  { %709 = vmatpush3.bf16.msra.mxu1 %v783_v27 }
  0x1e   :  { %710 = vmatprep.subr.bf16.mxu1 %v786_v30 }
  0x1f   :  { %689 = vmatpush3.bf16.msra.mxu0 %v785_v29 }
  0x20   :  { %729 = vmatprep.subr.bf16.mxu0 %v805_v35 }
  0x21   :  { %711 = vmatpush3.bf16.msra.mxu1 %v790_v34 }
  0x22   :  { %413 = vmatmul.mubr.bf16.vlgmr.msra.gmra.mrb[0].mxu0 %v625_v32  ;;  %749 = vmatprep.subr.mxu1 %v805_v35 }
  0x23   :  { %730 = vmatpush3.bf16.msra.mxu0 %v793_v39  ;;  %745 = vmatprep.mubr.msk.bf16.mxu0 %vm806_vm0, %v805_v35 }
  0x24   :  { %453 = vmatmul.mubr.bf16.vlgmr.msra.gmra.mrb[0].mxu1 %v627_v37  ;;  %731 = vmatprep.subr.bf16.mxu0 %v805_v35 }
  0x25   :  { %751 = vmatprep.mubr.msk.f32.mxu1 %vm806_vm0, %v805_v35 }
  0x27   :  { %732 = vmatpush3.bf16.msra.mxu0 %v794_v40 }
  0x28   :  { %733 = vmatprep.subr.bf16.mxu0 %v805_v35 }
  0x2b   :  { %734 = vmatpush3.bf16.msra.mxu0 %v795_v41 }
  0x2c   :  { %735 = vmatprep.subr.bf16.mxu0 %v805_v35 }
  0x2f   :  { %736 = vmatpush3.bf16.msra.mxu0 %v796_v42 }
  0x30   :  { %737 = vmatprep.subr.bf16.mxu0 %v805_v35 }
  0x33   :  { %738 = vmatpush3.bf16.msra.mxu0 %v797_v43 }
  0x34   :  { %739 = vmatprep.subr.bf16.mxu0 %v805_v35 }
  0x37   :  { %740 = vmatpush3.bf16.msra.mxu0 %v798_v44 }
  0x38   :  { %741 = vmatprep.subr.bf16.mxu0 %v805_v35 }
  0x3b   :  { %742 = vmatpush3.bf16.msra.mxu0 %v799_v45 }
  0x3c   :  { %743 = vmatprep.subr.bf16.mxu0 %v805_v35 }
  0x3f   :  { %744 = vmatpush3.bf16.msra.mxu0 %v800_v46 }
  0x42   :  { %746 = vmatmul.mubr.bf16.vlgmr.msra.gmra.mrb[4].mxu0 %v789_v47 }
  0xf5   :  { %v690_v48 = vpop.f32.mrb[0].mxu0 }
  0xf6   :  { %v691_v50 = vpop.f32.mrb[1].mxu0 }
  0xf7   :  { %v692_v51 = vadd.f32 %v691_v50, %v690_v48  ;;  %v693_v52 = vpop.f32.mrb[2].mxu0  ;;  %v712_v53 = vpop.f32.mrb[0].mxu1 }
  0xf8   :  { %v694_v54 = vpop.f32.mrb[3].mxu0  ;;  %v713_v55 = vpop.f32.mrb[1].mxu1 }
  0xf9   :  { %v415_v56 = vadd.f32 %v692_v51, %v624_v49  ;;  %v714_v57 = vadd.f32 %v713_v55, %v712_v53  ;;  %v715_v58 = vpop.f32.mrb[2].mxu1 }
  0xfa   :  { %v716_v59 = vpop.f32.mrb[3].mxu1 }
  0xfb   :  { %v455_v60 = vadd.f32 %v714_v57, %v415_v56 }
 0x115   :  { %v494_v61 = vpop.f32.mrb[4].mxu0 }
 0x116   :  { %v495_v62 = vadd.f32 %v494_v61, %v455_v60  ;;  %v747_v63 = vpop.f32.mrb[5].mxu0 }
 0x117   :  { %v497_v0 = vpop.f32.mrb[6].mxu0 }
 0x118   :  { %vm500_vm1 = vcmp.gt.f32.partialorder %v495_v62, 0.0  ;;  %v501_v1 = vmul.f32 0.2, %v495_v62  ;;  %v748_v3 = vpop.f32.mrb[7].mxu0 }
 0x11a   :  { %v502_v4 = vsel %vm500_vm1, %v495_v62, %v501_v1 }
 0x11b   :  { %v510_v6 = vmul.f32 %v670_v2, %v502_v4 }
 0x11d   :  { %v518_v8 = vadd.f32 %v671_v5, %v510_v6 }
 0x11f   :  { %v520_v9 = vmul.f32 %v519_v7, %v518_v8 }
 0x121   :  { %750 = vmatpush3.msra.mxu1 %v520_v9 }
 0x122   :  { %752 = vmatmul.mubr.msk.f32.vlgmr.msra.gmra.mrb[4].mxu1 %vm522_vm2, %v521_v10 }
 0x1f5   :  { %v592_v12 = vpop.f32.mrb[4].mxu1 }
 0x1f6   :  { %v597_v13 = vsel %vm596_vm3, %v592_v12, 0.0  ;;  %v753_v14 = vpop.f32.mrb[5].mxu1 }
 0x1f7   :  { %598 = vadd.xlane.f32.xlu0 %v597_v13 }
 0x284   :  { %v599_v16 = vpop.xlane.xlu0 %598 }
 0x285   :  { %v607_v17 = vadd.f32 %v673_v15, %v599_v16 }
 0x287   :  { %v608_v18 = vand.u32 2147483647, %v607_v17  ;;  %vm612_vm5 = vcmp.ge.f32.partialorder %v607_v17, 0.0 }
 0x289   :  { %v609_v19 = vsub.f32 0.0, %v608_v18 }
 0x28b   :  { %v610_v20 = vmul.f32 1.442695, %v609_v19 }
 0x28d   :  { %801 = vpow2.f32 %v610_v20 }
 0x297   :  { %v802_v21 = vpop.eup %801 }
 0x298   :  { %v613_v22 = vadd.f32 1.0, %v802_v21 }
 0x29a   :  { %803 = vrcp.f32 %v613_v22 }
 0x2a4   :  { %v804_v23 = vpop.eup %803 }
 0x2a5   :  { %v616_v24 = vmul.f32 %v804_v23, %v802_v21 }
 0x2a7   :  { %v617_v25 = vsel %vm612_vm5, %v804_v23, %v616_v24 }
 0x2a8   :  { %619 = vst.msk [vmem:[%s1010_s8] sm:$0x3] %vm618_vm4, %v617_v25 }

</bundles_post_ra>
